<compile_context>
chip_gen: v6e
topology: v6e:2x2x1
jax: 0.10.0
libtpu: 0.0.40
codegen_flags: <defaults>
</compile_context>

<pallas_src>
import functools

import jax
import jax.numpy as jnp
from jax import lax
from jax.experimental import pallas as pl
from jax.experimental.pallas import tpu as pltpu

EPS = 1e-6


def _layernorm(x, gamma, beta):
    mu = jnp.mean(x, axis=-1, keepdims=True)
    var = jnp.mean((x - mu) ** 2, axis=-1, keepdims=True)
    return (x - mu) * lax.rsqrt(var + EPS) * gamma + beta


def block_kernel(
    x_ref,                  # (1, T, D)   f32
    g1_ref, be1_ref,        # (1, D)      f32  layernorm1
    wqkv_ref, bqkv_ref,     # (D, 3D) bf16, (1, 3D) f32
    wprojh_ref, bproj_ref,  # (nH, hd, D) bf16 head-major, (1, D) f32
    g2_ref, be2_ref,        # (1, D)      f32  layernorm2
    w1_ref, bb1_ref,        # (D, H) bf16, (1, H) f32
    w2_ref, bb2_ref,        # (H, D) bf16, (1, D) f32
    out_ref,                # (1, Tq, D)  f32
    qkv_ref,                # (1, T, 3D)  f32  lane-dense q/k/v slab
    qkv_sc,                 # VMEM (T, 3D) f32 scratch (persists across t steps)
):
    T, D = x_ref.shape[1], x_ref.shape[2]
    Tq = out_ref.shape[1]
    nH, hd = wprojh_ref.shape[0], wprojh_ref.shape[1]
    scale = float(hd) ** (-0.5)
    t = pl.program_id(1)

    # ---- norm1 + fused qkv projection: once per batch element (t == 0) -----
    # Result stays resident in VMEM scratch for the remaining q-tile steps.
    @pl.when(t == 0)
    def _():
        x_full = x_ref[0].astype(jnp.float32)                       # (T, D)
        xn1 = _layernorm(x_full, g1_ref[...], be1_ref[...])
        qkv = jnp.dot(xn1.astype(jnp.bfloat16), wqkv_ref[...],
                      preferred_element_type=jnp.float32) + bqkv_ref[...]   # (T, 3D) f32
        qkv_sc[...] = qkv
        qkv_ref[0] = qkv.astype(qkv_ref.dtype)   # single lane-dense store

    # ---- this step's q-tile -------------------------------------------------
    row0 = pl.multiple_of(t * Tq, Tq)
    x_tile = x_ref[0, pl.ds(row0, Tq), :].astype(jnp.float32)        # (Tq, D)
    q_rows = qkv_sc[pl.ds(row0, Tq), :]                              # (Tq, 3D) f32
    kv_all = qkv_sc[...]                                             # (T, 3D)  f32

    # ---- multi-head attention (static per-head unroll, head-major proj) ----
    attn_acc = jnp.zeros((Tq, D), jnp.float32)
    for h in range(nH):
        qh = (q_rows[:, h * hd:(h + 1) * hd] * scale).astype(jnp.bfloat16)
        kh = kv_all[:, D + h * hd:D + (h + 1) * hd].astype(jnp.bfloat16)
        vh = kv_all[:, 2 * D + h * hd:2 * D + (h + 1) * hd].astype(jnp.bfloat16)

        # q @ k^T without materializing a transposed k; f32 accumulation.
        s = jnp.einsum("qd,kd->qk", qh, kh,
                       preferred_element_type=jnp.float32)           # (Tq, T)
        s = s - jnp.max(s, axis=-1, keepdims=True)
        p = jnp.exp(s)
        p = p * pl.reciprocal(jnp.sum(p, axis=-1, keepdims=True), approx=True)

        wa_h = jnp.dot(p.astype(jnp.bfloat16), vh,
                       preferred_element_type=jnp.float32)           # (Tq, hd)
        attn_acc = attn_acc + jnp.dot(wa_h.astype(jnp.bfloat16), wprojh_ref[h],
                                      preferred_element_type=jnp.float32)

    # ---- attention output projection bias + residual ------------------------
    x1 = x_tile + attn_acc + bproj_ref[...]                          # (Tq, D)

    # ---- norm2 + MLP + residual ---------------------------------------------
    xn2 = _layernorm(x1, g2_ref[...], be2_ref[...])
    h1 = jnp.dot(xn2.astype(jnp.bfloat16), w1_ref[...],
                 preferred_element_type=jnp.float32) + bb1_ref[...]  # (Tq, H)
    h1 = jax.nn.gelu(h1, approximate=True)        # tanh GELU -> EUP slot
    mlp_out = jnp.dot(h1.astype(jnp.bfloat16), w2_ref[...],
                      preferred_element_type=jnp.float32) + bb2_ref[...]

    out_ref[0] = (x1 + mlp_out).astype(out_ref.dtype)


@functools.partial(jax.jit,
                   static_argnames=("n_heads", "t_tile", "single_buffer_weights"))
def transformer_block(x, params, *, n_heads, t_tile=None,
                      single_buffer_weights=True):
    B, T, D = x.shape
    hd = D // n_heads
    H = params["w1"].shape[1]
    if t_tile is None:
        t_tile = T if T <= 128 else 128
    # TODO(synk): pad/mask ragged sequence lengths (e.g. ViT T=197 -> 208).
    assert T % t_tile == 0, "T must be a multiple of t_tile"

    # bf16 weights: halves DMA bytes + weight-resident VMEM, native MXU rate.
    bf16 = jnp.bfloat16
    wqkv = params["wqkv"].astype(bf16)                               # (D, 3D)
    wprojh = params["wproj"].reshape(n_heads, hd, D).astype(bf16)    # head-major
    w1 = params["w1"].astype(bf16)
    w2 = params["w2"].astype(bf16)

    def small(shape):          # small f32 vectors (biases / LN params)
        return pl.BlockSpec(shape, lambda b, t: (0, 0))

    def weight(shape):         # large constant-index weights
        idx = lambda b, t: (0,) * len(shape)
        if single_buffer_weights:
            # Same block every grid step -> double-buffering buys nothing.
            return pl.BlockSpec(shape, idx, pipeline_mode=pl.Buffered(1))
        return pl.BlockSpec(shape, idx)

    in_specs = [
        pl.BlockSpec((1, T, D), lambda b, t: (b, 0, 0)),             # x
        small((1, D)), small((1, D)),                                # norm1 g/b
        weight((D, 3 * D)), small((1, 3 * D)),                       # qkv w/b
        weight((n_heads, hd, D)), small((1, D)),                     # proj w/b
        small((1, D)), small((1, D)),                                # norm2 g/b
        weight((D, H)), small((1, H)),                               # fc1 w/b
        weight((H, D)), small((1, D)),                               # fc2 w/b
    ]
    out_specs = [
        pl.BlockSpec((1, t_tile, D), lambda b, t: (b, t, 0)),        # block out
        pl.BlockSpec((1, T, 3 * D), lambda b, t: (b, 0, 0)),         # qkv slab
    ]
    out_shape = (
        jax.ShapeDtypeStruct((B, T, D), jnp.float32),
        jax.ShapeDtypeStruct((B, T, 3 * D), jnp.float32),
    )

    # Advisory cost model so XLA can schedule neighbors around the custom call.
    flops = (2 * B * T * D * 3 * D      # qkv projection
             + 4 * B * T * T * D        # scores + attn @ v
             + 2 * B * T * D * D        # output projection
             + 4 * B * T * D * H)       # MLP
    transcendentals = B * (n_heads * T * T + T * H + n_heads * T + 2 * T)
    bytes_accessed = (4 * (B * T * D * 2 + B * T * 3 * D)
                      + 2 * (wqkv.size + wprojh.size + w1.size + w2.size)
                      + 4 * (6 * D + 3 * D + H))

    out, qkv = pl.pallas_call(
        block_kernel,
        out_shape=out_shape,
        grid_spec=pltpu.PrefetchScalarGridSpec(
            num_scalar_prefetch=0,
            grid=(B, T // t_tile),
            in_specs=in_specs,
            out_specs=out_specs,
            scratch_shapes=[pltpu.VMEM((T, 3 * D), jnp.float32)],
        ),
        compiler_params=pltpu.CompilerParams(
            dimension_semantics=("parallel", "arbitrary"),
            # <= 75% of v7x's 64 MiB physical VMEM; plenty on v5e/v6e (128 MiB).
            vmem_limit_bytes=48 * 1024 * 1024,
        ),
        cost_estimate=pl.CostEstimate(
            flops=flops, transcendentals=transcendentals,
            bytes_accessed=bytes_accessed),
    )(
        x,
        params["g1"], params["be1"],
        wqkv, params["bqkv"],
        wprojh, params["bproj"],
        params["g2"], params["be2"],
        w1, params["bb1"],
        w2, params["bb2"],
    )

    # (B, T, 3D) slab -> q/k/v each (B, n_heads, T, hd), matching the PyTorch
    # permute (kept in f32 because q/k/v are module outputs).
    qkv5 = qkv.reshape(B, T, 3, n_heads, hd).transpose(2, 0, 3, 1, 4)
    return out, qkv5[0], qkv5[1], qkv5[2]


def reference_block(x, params, *, n_heads):
    """Plain-JAX f32 reference mirroring the PyTorch forward exactly."""
    B, T, D = x.shape
    hd = D // n_heads
    scale = float(hd) ** (-0.5)

    def ln(z, g, b):
        mu = jnp.mean(z, axis=-1, keepdims=True)
        var = jnp.mean((z - mu) ** 2, axis=-1, keepdims=True)
        return (z - mu) * lax.rsqrt(var + EPS) * g + b

    xn1 = ln(x, params["g1"], params["be1"])
    qkv = xn1 @ params["wqkv"] + params["bqkv"]
    qkv = qkv.reshape(B, T, 3, n_heads, hd).transpose(2, 0, 3, 1, 4)
    q, k, v = qkv[0], qkv[1], qkv[2]
    dp = jnp.einsum("bhqd,bhkd->bhqk", q, k) * scale
    attn = jax.nn.softmax(dp, axis=-1)
    wa = jnp.einsum("bhqk,bhkd->bhqd", attn, v)
    wa = wa.transpose(0, 2, 1, 3).reshape(B, T, D)
    z = wa @ params["wproj"] + params["bproj"]
    x1 = x + z
    xn2 = ln(x1, params["g2"], params["be2"])
    h1 = jax.nn.gelu(xn2 @ params["w1"] + params["bb1"], approximate=False)
    out = x1 + h1 @ params["w2"] + params["bb2"]
    return out, q, k, v


def init_params(key, dim, n_heads, mlp_ratio=4.0):
    H = int(dim * mlp_ratio)
    ks = jax.random.split(key, 6)
    std = 0.02
    return {
        "g1": jnp.ones((1, dim), jnp.float32),
        "be1": jnp.zeros((1, dim), jnp.float32),
        "wqkv": std * jax.random.normal(ks[0], (dim, 3 * dim), jnp.float32),
        "bqkv": std * jax.random.normal(ks[1], (1, 3 * dim), jnp.float32),
        "wproj": std * jax.random.normal(ks[2], (dim, dim), jnp.float32),
        "bproj": jnp.zeros((1, dim), jnp.float32),
        "g2": jnp.ones((1, dim), jnp.float32),
        "be2": jnp.zeros((1, dim), jnp.float32),
        "w1": std * jax.random.normal(ks[3], (dim, H), jnp.float32),
        "bb1": std * jax.random.normal(ks[4], (1, H), jnp.float32),
        "w2": std * jax.random.normal(ks[5], (H, dim), jnp.float32),
        "bb2": jnp.zeros((1, dim), jnp.float32),
    }


if __name__ == "__main__":
    # Small shapes; T=16 with t_tile=8 exercises the (B, q-tile) grid (2x2).
    B, T, D, N_HEADS = 2, 16, 32, 4   # head_dim = 8, mlp hidden = 128

    key = jax.random.PRNGKey(0)
    kx, kp = jax.random.split(key)
    x = jax.random.normal(kx, (B, T, D), jnp.float32)
    params = init_params(kp, D, N_HEADS)

    try:
        out, q, k, v = transformer_block(x, params, n_heads=N_HEADS, t_tile=8)
        jax.block_until_ready((out, q, k, v))
    except Exception:
        # Portability fallback: some JAX builds reject BlockSpec pipeline_mode;
        # rerun with default (double-buffered) weight specs.
        out, q, k, v = transformer_block(x, params, n_heads=N_HEADS, t_tile=8,
                                         single_buffer_weights=False)
        jax.block_until_ready((out, q, k, v))

    ref_out, ref_q, ref_k, ref_v = reference_block(x, params, n_heads=N_HEADS)

    # q/k/v come from the bf16-operand qkv matmul (f32 accumulation).
    assert jnp.allclose(q, ref_q, atol=1e-2, rtol=1e-2)
    assert jnp.allclose(k, ref_k, atol=1e-2, rtol=1e-2)
    assert jnp.allclose(v, ref_v, atol=1e-2, rtol=1e-2)
    # Block output tolerance covers bf16 MXU operands, tanh GELU and the
    # approx (EUP) reciprocal in the softmax normalization.
    assert jnp.allclose(out, ref_out, atol=2e-2, rtol=2e-2)

    print("KERNEL_OK")
</pallas_src>

<mosaic_0001>
module attributes {stable_mosaic.version = 11 : i64} {
  func.func @block_kernel(%arg0: i32, %arg1: i32, %arg2: memref<1x16x32xf32, #tpu.memory_space<vmem>>, %arg3: memref<1x32xf32, #tpu.memory_space<vmem>>, %arg4: memref<1x32xf32, #tpu.memory_space<vmem>>, %arg5: memref<32x96xbf16, #tpu.memory_space<vmem>>, %arg6: memref<1x96xf32, #tpu.memory_space<vmem>>, %arg7: memref<4x8x32xbf16, #tpu.memory_space<vmem>>, %arg8: memref<1x32xf32, #tpu.memory_space<vmem>>, %arg9: memref<1x32xf32, #tpu.memory_space<vmem>>, %arg10: memref<1x32xf32, #tpu.memory_space<vmem>>, %arg11: memref<32x128xbf16, #tpu.memory_space<vmem>>, %arg12: memref<1x128xf32, #tpu.memory_space<vmem>>, %arg13: memref<128x32xbf16, #tpu.memory_space<vmem>>, %arg14: memref<1x32xf32, #tpu.memory_space<vmem>>, %arg15: memref<1x8x32xf32, #tpu.memory_space<vmem>>, %arg16: memref<1x16x96xf32, #tpu.memory_space<vmem>>, %arg17: memref<16x96xf32, #tpu.memory_space<vmem>>) attributes {dimension_semantics = [#tpu.dimension_semantics<parallel>, #tpu.dimension_semantics<arbitrary>], iteration_bounds = array<i64: 2, 2>, scalar_prefetch = 0 : i64, scratch_operands = 1 : i64, tpu.core_type = #tpu.core_type<tc>, window_params = [{transform_indices = @transform_0, window_bounds = array<i64: 1, 16, 32>}, {pipeline_mode = #tpu.pipeline_mode<synchronous>, transform_indices = @transform_1, window_bounds = array<i64: 1, 32>}, {pipeline_mode = #tpu.pipeline_mode<synchronous>, transform_indices = @transform_2, window_bounds = array<i64: 1, 32>}, {pipeline_mode = #tpu.pipeline_mode<synchronous>, transform_indices = @transform_3, window_bounds = array<i64: 32, 96>}, {pipeline_mode = #tpu.pipeline_mode<synchronous>, transform_indices = @transform_4, window_bounds = array<i64: 1, 96>}, {pipeline_mode = #tpu.pipeline_mode<synchronous>, transform_indices = @transform_5, window_bounds = array<i64: 4, 8, 32>}, {pipeline_mode = #tpu.pipeline_mode<synchronous>, transform_indices = @transform_6, window_bounds = array<i64: 1, 32>}, {pipeline_mode = #tpu.pipeline_mode<synchronous>, transform_indices = @transform_7, window_bounds = array<i64: 1, 32>}, {pipeline_mode = #tpu.pipeline_mode<synchronous>, transform_indices = @transform_8, window_bounds = array<i64: 1, 32>}, {pipeline_mode = #tpu.pipeline_mode<synchronous>, transform_indices = @transform_9, window_bounds = array<i64: 32, 128>}, {pipeline_mode = #tpu.pipeline_mode<synchronous>, transform_indices = @transform_10, window_bounds = array<i64: 1, 128>}, {pipeline_mode = #tpu.pipeline_mode<synchronous>, transform_indices = @transform_11, window_bounds = array<i64: 128, 32>}, {pipeline_mode = #tpu.pipeline_mode<synchronous>, transform_indices = @transform_12, window_bounds = array<i64: 1, 32>}, {transform_indices = @transform_13, window_bounds = array<i64: 1, 8, 32>}, {transform_indices = @transform_14, window_bounds = array<i64: 1, 16, 96>}]} {
    %c0_i32 = arith.constant 0 : i32
    %0 = arith.cmpi eq, %arg1, %c0_i32 : i32
    %1 = arith.extui %0 : i1 to i32
    %c0_i32_0 = arith.constant 0 : i32
    %2 = arith.cmpi ne, %1, %c0_i32_0 : i32
    scf.if %2 {
      %c0_66 = arith.constant 0 : index
      %c0_67 = arith.constant 0 : index
      %c0_68 = arith.constant 0 : index
      %173 = vector.load %arg2[%c0_66, %c0_67, %c0_68] : memref<1x16x32xf32, #tpu.memory_space<vmem>>, vector<1x16x32xf32>
      %174 = vector.shape_cast %173 : vector<1x16x32xf32> to vector<16x32xf32>
      %c0_69 = arith.constant 0 : index
      %c0_70 = arith.constant 0 : index
      %175 = vector.load %arg3[%c0_69, %c0_70] : memref<1x32xf32, #tpu.memory_space<vmem>>, vector<1x32xf32>
      %c0_71 = arith.constant 0 : index
      %c0_72 = arith.constant 0 : index
      %176 = vector.load %arg4[%c0_71, %c0_72] : memref<1x32xf32, #tpu.memory_space<vmem>>, vector<1x32xf32>
      %cst_73 = arith.constant dense<0.000000e+00> : vector<16xf32>
      %177 = vector.multi_reduction <add>, %174, %cst_73 [1] : vector<16x32xf32> to vector<16xf32>
      %178 = vector.shape_cast %177 : vector<16xf32> to vector<16x1xf32>
      %cst_74 = arith.constant 3.200000e+01 : f32
      %179 = vector.broadcast %cst_74 : f32 to vector<16x1xf32>
      %180 = arith.divf %178, %179 : vector<16x1xf32>
      %181 = vector.broadcast %180 : vector<16x1xf32> to vector<16x32xf32>
      %182 = arith.subf %174, %181 : vector<16x32xf32>
      %183 = arith.mulf %182, %182 : vector<16x32xf32>
      %cst_75 = arith.constant dense<0.000000e+00> : vector<16xf32>
      %184 = vector.multi_reduction <add>, %183, %cst_75 [1] : vector<16x32xf32> to vector<16xf32>
      %185 = vector.shape_cast %184 : vector<16xf32> to vector<16x1xf32>
      %cst_76 = arith.constant 3.200000e+01 : f32
      %186 = vector.broadcast %cst_76 : f32 to vector<16x1xf32>
      %187 = arith.divf %185, %186 : vector<16x1xf32>
      %188 = vector.broadcast %180 : vector<16x1xf32> to vector<16x32xf32>
      %189 = arith.subf %174, %188 : vector<16x32xf32>
      %cst_77 = arith.constant 9.99999997E-7 : f32
      %190 = vector.broadcast %cst_77 : f32 to vector<16x1xf32>
      %191 = arith.addf %187, %190 : vector<16x1xf32>
      %192 = math.rsqrt %191 : vector<16x1xf32>
      %193 = vector.broadcast %192 : vector<16x1xf32> to vector<16x32xf32>
      %194 = arith.mulf %189, %193 : vector<16x32xf32>
      %195 = vector.broadcast %175 : vector<1x32xf32> to vector<16x32xf32>
      %196 = arith.mulf %194, %195 : vector<16x32xf32>
      %197 = vector.broadcast %176 : vector<1x32xf32> to vector<16x32xf32>
      %198 = arith.addf %196, %197 : vector<16x32xf32>
      %199 = arith.truncf %198 : vector<16x32xf32> to vector<16x32xbf16>
      %c0_78 = arith.constant 0 : index
      %c0_79 = arith.constant 0 : index
      %200 = vector.load %arg5[%c0_78, %c0_79] : memref<32x96xbf16, #tpu.memory_space<vmem>>, vector<32x96xbf16>
      %cst_80 = arith.constant dense<0.000000e+00> : vector<16x96xf32>
      %201 = tpu.matmul %199, %200, %cst_80 {dimension_numbers = #tpu.dot_dimension_numbers<[1], [0], [0], [1], [0, 0, 1, 1], [], []>} : vector<16x32xbf16>, vector<32x96xbf16>, vector<16x96xf32> -> vector<16x96xf32>
      %c0_81 = arith.constant 0 : index
      %c0_82 = arith.constant 0 : index
      %202 = vector.load %arg6[%c0_81, %c0_82] : memref<1x96xf32, #tpu.memory_space<vmem>>, vector<1x96xf32>
      %203 = vector.broadcast %202 : vector<1x96xf32> to vector<16x96xf32>
      %204 = arith.addf %201, %203 : vector<16x96xf32>
      %c0_83 = arith.constant 0 : index
      %c0_84 = arith.constant 0 : index
      %205 = vector.load %arg17[%c0_83, %c0_84] : memref<16x96xf32, #tpu.memory_space<vmem>>, vector<16x96xf32>
      tpu.vector_store %arg17[%c0_83, %c0_84], %204 {strides = array<i32>} : memref<16x96xf32, #tpu.memory_space<vmem>>, vector<16x96xf32>,
      %c0_85 = arith.constant 0 : index
      %c0_86 = arith.constant 0 : index
      %c0_87 = arith.constant 0 : index
      %206 = vector.load %arg16[%c0_85, %c0_86, %c0_87] : memref<1x16x96xf32, #tpu.memory_space<vmem>>, vector<1x16x96xf32>
      %207 = vector.shape_cast %206 : vector<1x16x96xf32> to vector<16x96xf32>
      %208 = vector.shape_cast %204 : vector<16x96xf32> to vector<1x16x96xf32>
      tpu.vector_store %arg16[%c0_85, %c0_86, %c0_87], %208 {strides = array<i32>} : memref<1x16x96xf32, #tpu.memory_space<vmem>>, vector<1x16x96xf32>,
    } else {
    }
    %c8_i32 = arith.constant 8 : i32
    %3 = arith.muli %arg1, %c8_i32 : i32
    %4 = tpu.assume_multiple %3, 8 : i32
    %c0 = arith.constant 0 : index
    %5 = arith.index_cast %4 : i32 to index
    %c0_1 = arith.constant 0 : index
    %6 = vector.load %arg2[%c0, %5, %c0_1] : memref<1x16x32xf32, #tpu.memory_space<vmem>>, vector<1x8x32xf32>
    %7 = vector.shape_cast %6 : vector<1x8x32xf32> to vector<8x32xf32>
    %8 = arith.index_cast %4 : i32 to index
    %c0_2 = arith.constant 0 : index
    %9 = vector.load %arg17[%8, %c0_2] : memref<16x96xf32, #tpu.memory_space<vmem>>, vector<8x96xf32>
    %c0_3 = arith.constant 0 : index
    %c0_4 = arith.constant 0 : index
    %10 = vector.load %arg17[%c0_3, %c0_4] : memref<16x96xf32, #tpu.memory_space<vmem>>, vector<16x96xf32>
    %cst = arith.constant 0.000000e+00 : f32
    %11 = vector.broadcast %cst : f32 to vector<8x32xf32>
    %12 = vector.extract_strided_slice %9 {offsets = [0, 0], sizes = [8, 8], strides = [1, 1]} : vector<8x96xf32> to vector<8x8xf32>
    %cst_5 = arith.constant 0.353553385 : f32
    %13 = vector.broadcast %cst_5 : f32 to vector<8x8xf32>
    %14 = arith.mulf %12, %13 : vector<8x8xf32>
    %15 = arith.truncf %14 : vector<8x8xf32> to vector<8x8xbf16>
    %16 = vector.extract_strided_slice %10 {offsets = [0, 32], sizes = [16, 8], strides = [1, 1]} : vector<16x96xf32> to vector<16x8xf32>
    %17 = arith.truncf %16 : vector<16x8xf32> to vector<16x8xbf16>
    %18 = vector.extract_strided_slice %10 {offsets = [0, 64], sizes = [16, 8], strides = [1, 1]} : vector<16x96xf32> to vector<16x8xf32>
    %19 = arith.truncf %18 : vector<16x8xf32> to vector<16x8xbf16>
    "tpu.trace_start"() <{level = 10 : i32, message = "qd,kd->qk"}> : () -> ()
    %cst_6 = arith.constant dense<0.000000e+00> : vector<8x16xf32>
    %20 = tpu.matmul %15, %17, %cst_6 {dimension_numbers = #tpu.dot_dimension_numbers<[1], [1], [0], [0], [0, 0, 1, 0], [], []>} : vector<8x8xbf16>, vector<16x8xbf16>, vector<8x16xf32> -> vector<8x16xf32>
    "tpu.trace_stop"() : () -> ()
    %cst_7 = arith.constant dense<0xFF800000> : vector<8xf32>
    %21 = vector.multi_reduction <maximumf>, %20, %cst_7 [1] : vector<8x16xf32> to vector<8xf32>
    %22 = vector.shape_cast %21 : vector<8xf32> to vector<8x1xf32>
    %23 = vector.broadcast %22 : vector<8x1xf32> to vector<8x16xf32>
    %24 = arith.subf %20, %23 : vector<8x16xf32>
    %25 = math.exp %24 : vector<8x16xf32>
    %cst_8 = arith.constant dense<0.000000e+00> : vector<8xf32>
    %26 = vector.multi_reduction <add>, %25, %cst_8 [1] : vector<8x16xf32> to vector<8xf32>
    %27 = vector.shape_cast %26 : vector<8xf32> to vector<8x1xf32>
    %28 = tpu.reciprocal %27 {approx = true} : vector<8x1xf32> -> vector<8x1xf32>
    %29 = vector.broadcast %28 : vector<8x1xf32> to vector<8x16xf32>
    %30 = arith.mulf %25, %29 : vector<8x16xf32>
    %31 = arith.truncf %30 : vector<8x16xf32> to vector<8x16xbf16>
    %cst_9 = arith.constant dense<0.000000e+00> : vector<8x8xf32>
    %32 = tpu.matmul %31, %19, %cst_9 {dimension_numbers = #tpu.dot_dimension_numbers<[1], [0], [0], [1], [0, 0, 1, 1], [], []>} : vector<8x16xbf16>, vector<16x8xbf16>, vector<8x8xf32> -> vector<8x8xf32>
    %33 = arith.truncf %32 : vector<8x8xf32> to vector<8x8xbf16>
    %c0_10 = arith.constant 0 : index
    %c0_11 = arith.constant 0 : index
    %c0_12 = arith.constant 0 : index
    %34 = vector.load %arg7[%c0_10, %c0_11, %c0_12] : memref<4x8x32xbf16, #tpu.memory_space<vmem>>, vector<1x8x32xbf16>
    %35 = vector.shape_cast %34 : vector<1x8x32xbf16> to vector<8x32xbf16>
    %cst_13 = arith.constant dense<0.000000e+00> : vector<8x32xf32>
    %36 = tpu.matmul %33, %35, %cst_13 {dimension_numbers = #tpu.dot_dimension_numbers<[1], [0], [0], [1], [0, 0, 1, 1], [], []>} : vector<8x8xbf16>, vector<8x32xbf16>, vector<8x32xf32> -> vector<8x32xf32>
    %37 = arith.addf %11, %36 : vector<8x32xf32>
    %38 = vector.extract_strided_slice %9 {offsets = [0, 8], sizes = [8, 8], strides = [1, 1]} : vector<8x96xf32> to vector<8x8xf32>
    %cst_14 = arith.constant 0.353553385 : f32
    %39 = vector.broadcast %cst_14 : f32 to vector<8x8xf32>
    %40 = arith.mulf %38, %39 : vector<8x8xf32>
    %41 = arith.truncf %40 : vector<8x8xf32> to vector<8x8xbf16>
    %42 = vector.extract_strided_slice %10 {offsets = [0, 40], sizes = [16, 8], strides = [1, 1]} : vector<16x96xf32> to vector<16x8xf32>
    %43 = arith.truncf %42 : vector<16x8xf32> to vector<16x8xbf16>
    %44 = vector.extract_strided_slice %10 {offsets = [0, 72], sizes = [16, 8], strides = [1, 1]} : vector<16x96xf32> to vector<16x8xf32>
    %45 = arith.truncf %44 : vector<16x8xf32> to vector<16x8xbf16>
    "tpu.trace_start"() <{level = 10 : i32, message = "qd,kd->qk"}> : () -> ()
    %cst_15 = arith.constant dense<0.000000e+00> : vector<8x16xf32>
    %46 = tpu.matmul %41, %43, %cst_15 {dimension_numbers = #tpu.dot_dimension_numbers<[1], [1], [0], [0], [0, 0, 1, 0], [], []>} : vector<8x8xbf16>, vector<16x8xbf16>, vector<8x16xf32> -> vector<8x16xf32>
    "tpu.trace_stop"() : () -> ()
    %cst_16 = arith.constant dense<0xFF800000> : vector<8xf32>
    %47 = vector.multi_reduction <maximumf>, %46, %cst_16 [1] : vector<8x16xf32> to vector<8xf32>
    %48 = vector.shape_cast %47 : vector<8xf32> to vector<8x1xf32>
    %49 = vector.broadcast %48 : vector<8x1xf32> to vector<8x16xf32>
    %50 = arith.subf %46, %49 : vector<8x16xf32>
    %51 = math.exp %50 : vector<8x16xf32>
    %cst_17 = arith.constant dense<0.000000e+00> : vector<8xf32>
    %52 = vector.multi_reduction <add>, %51, %cst_17 [1] : vector<8x16xf32> to vector<8xf32>
    %53 = vector.shape_cast %52 : vector<8xf32> to vector<8x1xf32>
    %54 = tpu.reciprocal %53 {approx = true} : vector<8x1xf32> -> vector<8x1xf32>
    %55 = vector.broadcast %54 : vector<8x1xf32> to vector<8x16xf32>
    %56 = arith.mulf %51, %55 : vector<8x16xf32>
    %57 = arith.truncf %56 : vector<8x16xf32> to vector<8x16xbf16>
    %cst_18 = arith.constant dense<0.000000e+00> : vector<8x8xf32>
    %58 = tpu.matmul %57, %45, %cst_18 {dimension_numbers = #tpu.dot_dimension_numbers<[1], [0], [0], [1], [0, 0, 1, 1], [], []>} : vector<8x16xbf16>, vector<16x8xbf16>, vector<8x8xf32> -> vector<8x8xf32>
    %59 = arith.truncf %58 : vector<8x8xf32> to vector<8x8xbf16>
    %c1 = arith.constant 1 : index
    %c0_19 = arith.constant 0 : index
    %c0_20 = arith.constant 0 : index
    %60 = vector.load %arg7[%c1, %c0_19, %c0_20] : memref<4x8x32xbf16, #tpu.memory_space<vmem>>, vector<1x8x32xbf16>
    %61 = vector.shape_cast %60 : vector<1x8x32xbf16> to vector<8x32xbf16>
    %cst_21 = arith.constant dense<0.000000e+00> : vector<8x32xf32>
    %62 = tpu.matmul %59, %61, %cst_21 {dimension_numbers = #tpu.dot_dimension_numbers<[1], [0], [0], [1], [0, 0, 1, 1], [], []>} : vector<8x8xbf16>, vector<8x32xbf16>, vector<8x32xf32> -> vector<8x32xf32>
    %63 = arith.addf %37, %62 : vector<8x32xf32>
    %64 = vector.extract_strided_slice %9 {offsets = [0, 16], sizes = [8, 8], strides = [1, 1]} : vector<8x96xf32> to vector<8x8xf32>
    %cst_22 = arith.constant 0.353553385 : f32
    %65 = vector.broadcast %cst_22 : f32 to vector<8x8xf32>
    %66 = arith.mulf %64, %65 : vector<8x8xf32>
    %67 = arith.truncf %66 : vector<8x8xf32> to vector<8x8xbf16>
    %68 = vector.extract_strided_slice %10 {offsets = [0, 48], sizes = [16, 8], strides = [1, 1]} : vector<16x96xf32> to vector<16x8xf32>
    %69 = arith.truncf %68 : vector<16x8xf32> to vector<16x8xbf16>
    %70 = vector.extract_strided_slice %10 {offsets = [0, 80], sizes = [16, 8], strides = [1, 1]} : vector<16x96xf32> to vector<16x8xf32>
    %71 = arith.truncf %70 : vector<16x8xf32> to vector<16x8xbf16>
    "tpu.trace_start"() <{level = 10 : i32, message = "qd,kd->qk"}> : () -> ()
    %cst_23 = arith.constant dense<0.000000e+00> : vector<8x16xf32>
    %72 = tpu.matmul %67, %69, %cst_23 {dimension_numbers = #tpu.dot_dimension_numbers<[1], [1], [0], [0], [0, 0, 1, 0], [], []>} : vector<8x8xbf16>, vector<16x8xbf16>, vector<8x16xf32> -> vector<8x16xf32>
    "tpu.trace_stop"() : () -> ()
    %cst_24 = arith.constant dense<0xFF800000> : vector<8xf32>
    %73 = vector.multi_reduction <maximumf>, %72, %cst_24 [1] : vector<8x16xf32> to vector<8xf32>
    %74 = vector.shape_cast %73 : vector<8xf32> to vector<8x1xf32>
    %75 = vector.broadcast %74 : vector<8x1xf32> to vector<8x16xf32>
    %76 = arith.subf %72, %75 : vector<8x16xf32>
    %77 = math.exp %76 : vector<8x16xf32>
    %cst_25 = arith.constant dense<0.000000e+00> : vector<8xf32>
    %78 = vector.multi_reduction <add>, %77, %cst_25 [1] : vector<8x16xf32> to vector<8xf32>
    %79 = vector.shape_cast %78 : vector<8xf32> to vector<8x1xf32>
    %80 = tpu.reciprocal %79 {approx = true} : vector<8x1xf32> -> vector<8x1xf32>
    %81 = vector.broadcast %80 : vector<8x1xf32> to vector<8x16xf32>
    %82 = arith.mulf %77, %81 : vector<8x16xf32>
    %83 = arith.truncf %82 : vector<8x16xf32> to vector<8x16xbf16>
    %cst_26 = arith.constant dense<0.000000e+00> : vector<8x8xf32>
    %84 = tpu.matmul %83, %71, %cst_26 {dimension_numbers = #tpu.dot_dimension_numbers<[1], [0], [0], [1], [0, 0, 1, 1], [], []>} : vector<8x16xbf16>, vector<16x8xbf16>, vector<8x8xf32> -> vector<8x8xf32>
    %85 = arith.truncf %84 : vector<8x8xf32> to vector<8x8xbf16>
    %c2 = arith.constant 2 : index
    %c0_27 = arith.constant 0 : index
    %c0_28 = arith.constant 0 : index
    %86 = vector.load %arg7[%c2, %c0_27, %c0_28] : memref<4x8x32xbf16, #tpu.memory_space<vmem>>, vector<1x8x32xbf16>
    %87 = vector.shape_cast %86 : vector<1x8x32xbf16> to vector<8x32xbf16>
    %cst_29 = arith.constant dense<0.000000e+00> : vector<8x32xf32>
    %88 = tpu.matmul %85, %87, %cst_29 {dimension_numbers = #tpu.dot_dimension_numbers<[1], [0], [0], [1], [0, 0, 1, 1], [], []>} : vector<8x8xbf16>, vector<8x32xbf16>, vector<8x32xf32> -> vector<8x32xf32>
    %89 = arith.addf %63, %88 : vector<8x32xf32>
    %90 = vector.extract_strided_slice %9 {offsets = [0, 24], sizes = [8, 8], strides = [1, 1]} : vector<8x96xf32> to vector<8x8xf32>
    %cst_30 = arith.constant 0.353553385 : f32
    %91 = vector.broadcast %cst_30 : f32 to vector<8x8xf32>
    %92 = arith.mulf %90, %91 : vector<8x8xf32>
    %93 = arith.truncf %92 : vector<8x8xf32> to vector<8x8xbf16>
    %94 = vector.extract_strided_slice %10 {offsets = [0, 56], sizes = [16, 8], strides = [1, 1]} : vector<16x96xf32> to vector<16x8xf32>
    %95 = arith.truncf %94 : vector<16x8xf32> to vector<16x8xbf16>
    %96 = vector.extract_strided_slice %10 {offsets = [0, 88], sizes = [16, 8], strides = [1, 1]} : vector<16x96xf32> to vector<16x8xf32>
    %97 = arith.truncf %96 : vector<16x8xf32> to vector<16x8xbf16>
    "tpu.trace_start"() <{level = 10 : i32, message = "qd,kd->qk"}> : () -> ()
    %cst_31 = arith.constant dense<0.000000e+00> : vector<8x16xf32>
    %98 = tpu.matmul %93, %95, %cst_31 {dimension_numbers = #tpu.dot_dimension_numbers<[1], [1], [0], [0], [0, 0, 1, 0], [], []>} : vector<8x8xbf16>, vector<16x8xbf16>, vector<8x16xf32> -> vector<8x16xf32>
    "tpu.trace_stop"() : () -> ()
    %cst_32 = arith.constant dense<0xFF800000> : vector<8xf32>
    %99 = vector.multi_reduction <maximumf>, %98, %cst_32 [1] : vector<8x16xf32> to vector<8xf32>
    %100 = vector.shape_cast %99 : vector<8xf32> to vector<8x1xf32>
    %101 = vector.broadcast %100 : vector<8x1xf32> to vector<8x16xf32>
    %102 = arith.subf %98, %101 : vector<8x16xf32>
    %103 = math.exp %102 : vector<8x16xf32>
    %cst_33 = arith.constant dense<0.000000e+00> : vector<8xf32>
    %104 = vector.multi_reduction <add>, %103, %cst_33 [1] : vector<8x16xf32> to vector<8xf32>
    %105 = vector.shape_cast %104 : vector<8xf32> to vector<8x1xf32>
    %106 = tpu.reciprocal %105 {approx = true} : vector<8x1xf32> -> vector<8x1xf32>
    %107 = vector.broadcast %106 : vector<8x1xf32> to vector<8x16xf32>
    %108 = arith.mulf %103, %107 : vector<8x16xf32>
    %109 = arith.truncf %108 : vector<8x16xf32> to vector<8x16xbf16>
    %cst_34 = arith.constant dense<0.000000e+00> : vector<8x8xf32>
    %110 = tpu.matmul %109, %97, %cst_34 {dimension_numbers = #tpu.dot_dimension_numbers<[1], [0], [0], [1], [0, 0, 1, 1], [], []>} : vector<8x16xbf16>, vector<16x8xbf16>, vector<8x8xf32> -> vector<8x8xf32>
    %111 = arith.truncf %110 : vector<8x8xf32> to vector<8x8xbf16>
    %c3 = arith.constant 3 : index
    %c0_35 = arith.constant 0 : index
    %c0_36 = arith.constant 0 : index
    %112 = vector.load %arg7[%c3, %c0_35, %c0_36] : memref<4x8x32xbf16, #tpu.memory_space<vmem>>, vector<1x8x32xbf16>
    %113 = vector.shape_cast %112 : vector<1x8x32xbf16> to vector<8x32xbf16>
    %cst_37 = arith.constant dense<0.000000e+00> : vector<8x32xf32>
    %114 = tpu.matmul %111, %113, %cst_37 {dimension_numbers = #tpu.dot_dimension_numbers<[1], [0], [0], [1], [0, 0, 1, 1], [], []>} : vector<8x8xbf16>, vector<8x32xbf16>, vector<8x32xf32> -> vector<8x32xf32>
    %115 = arith.addf %89, %114 : vector<8x32xf32>
    %116 = arith.addf %7, %115 : vector<8x32xf32>
    %c0_38 = arith.constant 0 : index
    %c0_39 = arith.constant 0 : index
    %117 = vector.load %arg8[%c0_38, %c0_39] : memref<1x32xf32, #tpu.memory_space<vmem>>, vector<1x32xf32>
    %118 = vector.broadcast %117 : vector<1x32xf32> to vector<8x32xf32>
    %119 = arith.addf %116, %118 : vector<8x32xf32>
    %c0_40 = arith.constant 0 : index
    %c0_41 = arith.constant 0 : index
    %120 = vector.load %arg9[%c0_40, %c0_41] : memref<1x32xf32, #tpu.memory_space<vmem>>, vector<1x32xf32>
    %c0_42 = arith.constant 0 : index
    %c0_43 = arith.constant 0 : index
    %121 = vector.load %arg10[%c0_42, %c0_43] : memref<1x32xf32, #tpu.memory_space<vmem>>, vector<1x32xf32>
    %cst_44 = arith.constant dense<0.000000e+00> : vector<8xf32>
    %122 = vector.multi_reduction <add>, %119, %cst_44 [1] : vector<8x32xf32> to vector<8xf32>
    %123 = vector.shape_cast %122 : vector<8xf32> to vector<8x1xf32>
    %cst_45 = arith.constant 3.200000e+01 : f32
    %124 = vector.broadcast %cst_45 : f32 to vector<8x1xf32>
    %125 = arith.divf %123, %124 : vector<8x1xf32>
    %126 = vector.broadcast %125 : vector<8x1xf32> to vector<8x32xf32>
    %127 = arith.subf %119, %126 : vector<8x32xf32>
    %128 = arith.mulf %127, %127 : vector<8x32xf32>
    %cst_46 = arith.constant dense<0.000000e+00> : vector<8xf32>
    %129 = vector.multi_reduction <add>, %128, %cst_46 [1] : vector<8x32xf32> to vector<8xf32>
    %130 = vector.shape_cast %129 : vector<8xf32> to vector<8x1xf32>
    %cst_47 = arith.constant 3.200000e+01 : f32
    %131 = vector.broadcast %cst_47 : f32 to vector<8x1xf32>
    %132 = arith.divf %130, %131 : vector<8x1xf32>
    %133 = vector.broadcast %125 : vector<8x1xf32> to vector<8x32xf32>
    %134 = arith.subf %119, %133 : vector<8x32xf32>
    %cst_48 = arith.constant 9.99999997E-7 : f32
    %135 = vector.broadcast %cst_48 : f32 to vector<8x1xf32>
    %136 = arith.addf %132, %135 : vector<8x1xf32>
    %137 = math.rsqrt %136 : vector<8x1xf32>
    %138 = vector.broadcast %137 : vector<8x1xf32> to vector<8x32xf32>
    %139 = arith.mulf %134, %138 : vector<8x32xf32>
    %140 = vector.broadcast %120 : vector<1x32xf32> to vector<8x32xf32>
    %141 = arith.mulf %139, %140 : vector<8x32xf32>
    %142 = vector.broadcast %121 : vector<1x32xf32> to vector<8x32xf32>
    %143 = arith.addf %141, %142 : vector<8x32xf32>
    %144 = arith.truncf %143 : vector<8x32xf32> to vector<8x32xbf16>
    %c0_49 = arith.constant 0 : index
    %c0_50 = arith.constant 0 : index
    %145 = vector.load %arg11[%c0_49, %c0_50] : memref<32x128xbf16, #tpu.memory_space<vmem>>, vector<32x128xbf16>
    %cst_51 = arith.constant dense<0.000000e+00> : vector<8x128xf32>
    %146 = tpu.matmul %144, %145, %cst_51 {dimension_numbers = #tpu.dot_dimension_numbers<[1], [0], [0], [1], [0, 0, 1, 1], [], []>} : vector<8x32xbf16>, vector<32x128xbf16>, vector<8x128xf32> -> vector<8x128xf32>
    %c0_52 = arith.constant 0 : index
    %c0_53 = arith.constant 0 : index
    %147 = vector.load %arg12[%c0_52, %c0_53] : memref<1x128xf32, #tpu.memory_space<vmem>>, vector<1x128xf32>
    %148 = vector.broadcast %147 : vector<1x128xf32> to vector<8x128xf32>
    %149 = arith.addf %146, %148 : vector<8x128xf32>
    %150 = arith.mulf %149, %149 : vector<8x128xf32>
    %151 = arith.mulf %149, %150 : vector<8x128xf32>
    %cst_54 = arith.constant 4.471500e-02 : f32
    %152 = vector.broadcast %cst_54 : f32 to vector<8x128xf32>
    %153 = arith.mulf %152, %151 : vector<8x128xf32>
    %154 = arith.addf %149, %153 : vector<8x128xf32>
    %cst_55 = arith.constant 0.797884583 : f32
    %155 = vector.broadcast %cst_55 : f32 to vector<8x128xf32>
    %156 = arith.mulf %155, %154 : vector<8x128xf32>
    %157 = math.tanh %156 : vector<8x128xf32>
    %cst_56 = arith.constant 1.000000e+00 : f32
    %158 = vector.broadcast %cst_56 : f32 to vector<8x128xf32>
    %159 = arith.addf %158, %157 : vector<8x128xf32>
    %cst_57 = arith.constant 5.000000e-01 : f32
    %160 = vector.broadcast %cst_57 : f32 to vector<8x128xf32>
    %161 = arith.mulf %160, %159 : vector<8x128xf32>
    %162 = arith.mulf %149, %161 : vector<8x128xf32>
    %163 = arith.truncf %162 : vector<8x128xf32> to vector<8x128xbf16>
    %c0_58 = arith.constant 0 : index
    %c0_59 = arith.constant 0 : index
    %164 = vector.load %arg13[%c0_58, %c0_59] : memref<128x32xbf16, #tpu.memory_space<vmem>>, vector<128x32xbf16>
    %cst_60 = arith.constant dense<0.000000e+00> : vector<8x32xf32>
    %165 = tpu.matmul %163, %164, %cst_60 {dimension_numbers = #tpu.dot_dimension_numbers<[1], [0], [0], [1], [0, 0, 1, 1], [], []>} : vector<8x128xbf16>, vector<128x32xbf16>, vector<8x32xf32> -> vector<8x32xf32>
    %c0_61 = arith.constant 0 : index
    %c0_62 = arith.constant 0 : index
    %166 = vector.load %arg14[%c0_61, %c0_62] : memref<1x32xf32, #tpu.memory_space<vmem>>, vector<1x32xf32>
    %167 = vector.broadcast %166 : vector<1x32xf32> to vector<8x32xf32>
    %168 = arith.addf %165, %167 : vector<8x32xf32>
    %169 = arith.addf %119, %168 : vector<8x32xf32>
    %c0_63 = arith.constant 0 : index
    %c0_64 = arith.constant 0 : index
    %c0_65 = arith.constant 0 : index
    %170 = vector.load %arg15[%c0_63, %c0_64, %c0_65] : memref<1x8x32xf32, #tpu.memory_space<vmem>>, vector<1x8x32xf32>
    %171 = vector.shape_cast %170 : vector<1x8x32xf32> to vector<8x32xf32>
    %172 = vector.shape_cast %169 : vector<8x32xf32> to vector<1x8x32xf32>
    tpu.vector_store %arg15[%c0_63, %c0_64, %c0_65], %172 {strides = array<i32>} : memref<1x8x32xf32, #tpu.memory_space<vmem>>, vector<1x8x32xf32>,
    return
  }
  func.func @transform_0(%arg0: i32, %arg1: i32) -> (i32, i32, i32) {
    %c0_i32 = arith.constant 0 : i32
    %c0_i32_0 = arith.constant 0 : i32
    %c0_i32_1 = arith.constant 0 : i32
    return %arg0, %c0_i32, %c0_i32_0 : i32, i32, i32
  }
  func.func @transform_1(%arg0: i32, %arg1: i32) -> (i32, i32) {
    %c0_i32 = arith.constant 0 : i32
    %c0_i32_0 = arith.constant 0 : i32
    %c0_i32_1 = arith.constant 0 : i32
    return %c0_i32, %c0_i32_0 : i32, i32
  }
  func.func @transform_2(%arg0: i32, %arg1: i32) -> (i32, i32) {
    %c0_i32 = arith.constant 0 : i32
    %c0_i32_0 = arith.constant 0 : i32
    %c0_i32_1 = arith.constant 0 : i32
    return %c0_i32, %c0_i32_0 : i32, i32
  }
  func.func @transform_3(%arg0: i32, %arg1: i32) -> (i32, i32) {
    %c0_i32 = arith.constant 0 : i32
    %c0_i32_0 = arith.constant 0 : i32
    %c0_i32_1 = arith.constant 0 : i32
    return %c0_i32, %c0_i32_0 : i32, i32
  }
  func.func @transform_4(%arg0: i32, %arg1: i32) -> (i32, i32) {
    %c0_i32 = arith.constant 0 : i32
    %c0_i32_0 = arith.constant 0 : i32
    %c0_i32_1 = arith.constant 0 : i32
    return %c0_i32, %c0_i32_0 : i32, i32
  }
  func.func @transform_5(%arg0: i32, %arg1: i32) -> (i32, i32, i32) {
    %c0_i32 = arith.constant 0 : i32
    %c0_i32_0 = arith.constant 0 : i32
    %c0_i32_1 = arith.constant 0 : i32
    %c0_i32_2 = arith.constant 0 : i32
    return %c0_i32, %c0_i32_0, %c0_i32_1 : i32, i32, i32
  }
  func.func @transform_6(%arg0: i32, %arg1: i32) -> (i32, i32) {
    %c0_i32 = arith.constant 0 : i32
    %c0_i32_0 = arith.constant 0 : i32
    %c0_i32_1 = arith.constant 0 : i32
    return %c0_i32, %c0_i32_0 : i32, i32
  }
  func.func @transform_7(%arg0: i32, %arg1: i32) -> (i32, i32) {
    %c0_i32 = arith.constant 0 : i32
    %c0_i32_0 = arith.constant 0 : i32
    %c0_i32_1 = arith.constant 0 : i32
    return %c0_i32, %c0_i32_0 : i32, i32
  }
  func.func @transform_8(%arg0: i32, %arg1: i32) -> (i32, i32) {
    %c0_i32 = arith.constant 0 : i32
    %c0_i32_0 = arith.constant 0 : i32
    %c0_i32_1 = arith.constant 0 : i32
    return %c0_i32, %c0_i32_0 : i32, i32
  }
  func.func @transform_9(%arg0: i32, %arg1: i32) -> (i32, i32) {
    %c0_i32 = arith.constant 0 : i32
    %c0_i32_0 = arith.constant 0 : i32
    %c0_i32_1 = arith.constant 0 : i32
    return %c0_i32, %c0_i32_0 : i32, i32
  }
  func.func @transform_10(%arg0: i32, %arg1: i32) -> (i32, i32) {
    %c0_i32 = arith.constant 0 : i32
    %c0_i32_0 = arith.constant 0 : i32
    %c0_i32_1 = arith.constant 0 : i32
    return %c0_i32, %c0_i32_0 : i32, i32
  }
  func.func @transform_11(%arg0: i32, %arg1: i32) -> (i32, i32) {
    %c0_i32 = arith.constant 0 : i32
    %c0_i32_0 = arith.constant 0 : i32
    %c0_i32_1 = arith.constant 0 : i32
    return %c0_i32, %c0_i32_0 : i32, i32
  }
  func.func @transform_12(%arg0: i32, %arg1: i32) -> (i32, i32) {
    %c0_i32 = arith.constant 0 : i32
    %c0_i32_0 = arith.constant 0 : i32
    %c0_i32_1 = arith.constant 0 : i32
    return %c0_i32, %c0_i32_0 : i32, i32
  }
  func.func @transform_13(%arg0: i32, %arg1: i32) -> (i32, i32, i32) {
    %c0_i32 = arith.constant 0 : i32
    %c0_i32_0 = arith.constant 0 : i32
    return %arg0, %arg1, %c0_i32 : i32, i32, i32
  }
  func.func @transform_14(%arg0: i32, %arg1: i32) -> (i32, i32, i32) {
    %c0_i32 = arith.constant 0 : i32
    %c0_i32_0 = arith.constant 0 : i32
    %c0_i32_1 = arith.constant 0 : i32
    return %arg0, %c0_i32, %c0_i32_0 : i32, i32, i32
  }
}

module attributes {stable_mosaic.version = 11 : i64} {
  func.func @block_kernel(%arg0: i32, %arg1: i32, %arg2: memref<1x16x32xf32, #tpu.memory_space<vmem>>, %arg3: memref<1x32xf32, #tpu.memory_space<vmem>>, %arg4: memref<1x32xf32, #tpu.memory_space<vmem>>, %arg5: memref<32x96xbf16, #tpu.memory_space<vmem>>, %arg6: memref<1x96xf32, #tpu.memory_space<vmem>>, %arg7: memref<4x8x32xbf16, #tpu.memory_space<vmem>>, %arg8: memref<1x32xf32, #tpu.memory_space<vmem>>, %arg9: memref<1x32xf32, #tpu.memory_space<vmem>>, %arg10: memref<1x32xf32, #tpu.memory_space<vmem>>, %arg11: memref<32x128xbf16, #tpu.memory_space<vmem>>, %arg12: memref<1x128xf32, #tpu.memory_space<vmem>>, %arg13: memref<128x32xbf16, #tpu.memory_space<vmem>>, %arg14: memref<1x32xf32, #tpu.memory_space<vmem>>, %arg15: memref<1x8x32xf32, #tpu.memory_space<vmem>>, %arg16: memref<1x16x96xf32, #tpu.memory_space<vmem>>, %arg17: memref<16x96xf32, #tpu.memory_space<vmem>>) attributes {dimension_semantics = [#tpu.dimension_semantics<parallel>, #tpu.dimension_semantics<arbitrary>], iteration_bounds = array<i64: 2, 2>, scalar_prefetch = 0 : i64, scratch_operands = 1 : i64, tpu.core_type = #tpu.core_type<tc>, window_params = [{transform_indices = @transform_0, window_bounds = array<i64: 1, 16, 32>}, {pipeline_mode = #tpu.pipeline_mode<synchronous>, transform_indices = @transform_1, window_bounds = array<i64: 1, 32>}, {pipeline_mode = #tpu.pipeline_mode<synchronous>, transform_indices = @transform_2, window_bounds = array<i64: 1, 32>}, {pipeline_mode = #tpu.pipeline_mode<synchronous>, transform_indices = @transform_3, window_bounds = array<i64: 32, 96>}, {pipeline_mode = #tpu.pipeline_mode<synchronous>, transform_indices = @transform_4, window_bounds = array<i64: 1, 96>}, {pipeline_mode = #tpu.pipeline_mode<synchronous>, transform_indices = @transform_5, window_bounds = array<i64: 4, 8, 32>}, {pipeline_mode = #tpu.pipeline_mode<synchronous>, transform_indices = @transform_6, window_bounds = array<i64: 1, 32>}, {pipeline_mode = #tpu.pipeline_mode<synchronous>, transform_indices = @transform_7, window_bounds = array<i64: 1, 32>}, {pipeline_mode = #tpu.pipeline_mode<synchronous>, transform_indices = @transform_8, window_bounds = array<i64: 1, 32>}, {pipeline_mode = #tpu.pipeline_mode<synchronous>, transform_indices = @transform_9, window_bounds = array<i64: 32, 128>}, {pipeline_mode = #tpu.pipeline_mode<synchronous>, transform_indices = @transform_10, window_bounds = array<i64: 1, 128>}, {pipeline_mode = #tpu.pipeline_mode<synchronous>, transform_indices = @transform_11, window_bounds = array<i64: 128, 32>}, {pipeline_mode = #tpu.pipeline_mode<synchronous>, transform_indices = @transform_12, window_bounds = array<i64: 1, 32>}, {transform_indices = @transform_13, window_bounds = array<i64: 1, 8, 32>}, {transform_indices = @transform_14, window_bounds = array<i64: 1, 16, 96>}]} {
    %c0_i32 = arith.constant 0 : i32
    %0 = arith.cmpi eq, %arg1, %c0_i32 : i32
    %1 = arith.extui %0 : i1 to i32
    %c0_i32_0 = arith.constant 0 : i32
    %2 = arith.cmpi ne, %1, %c0_i32_0 : i32
    scf.if %2 {
      %c0_66 = arith.constant 0 : index
      %c0_67 = arith.constant 0 : index
      %c0_68 = arith.constant 0 : index
      %173 = vector.load %arg2[%c0_66, %c0_67, %c0_68] : memref<1x16x32xf32, #tpu.memory_space<vmem>>, vector<1x16x32xf32>
      %174 = vector.shape_cast %173 : vector<1x16x32xf32> to vector<16x32xf32>
      %c0_69 = arith.constant 0 : index
      %c0_70 = arith.constant 0 : index
      %175 = vector.load %arg3[%c0_69, %c0_70] : memref<1x32xf32, #tpu.memory_space<vmem>>, vector<1x32xf32>
      %c0_71 = arith.constant 0 : index
      %c0_72 = arith.constant 0 : index
      %176 = vector.load %arg4[%c0_71, %c0_72] : memref<1x32xf32, #tpu.memory_space<vmem>>, vector<1x32xf32>
      %cst_73 = arith.constant dense<0.000000e+00> : vector<16xf32>
      %177 = vector.multi_reduction <add>, %174, %cst_73 [1] : vector<16x32xf32> to vector<16xf32>
      %178 = vector.shape_cast %177 : vector<16xf32> to vector<16x1xf32>
      %cst_74 = arith.constant 3.200000e+01 : f32
      %179 = vector.broadcast %cst_74 : f32 to vector<16x1xf32>
      %180 = arith.divf %178, %179 : vector<16x1xf32>
      %181 = vector.broadcast %180 : vector<16x1xf32> to vector<16x32xf32>
      %182 = arith.subf %174, %181 : vector<16x32xf32>
      %183 = arith.mulf %182, %182 : vector<16x32xf32>
      %cst_75 = arith.constant dense<0.000000e+00> : vector<16xf32>
      %184 = vector.multi_reduction <add>, %183, %cst_75 [1] : vector<16x32xf32> to vector<16xf32>
      %185 = vector.shape_cast %184 : vector<16xf32> to vector<16x1xf32>
      %cst_76 = arith.constant 3.200000e+01 : f32
      %186 = vector.broadcast %cst_76 : f32 to vector<16x1xf32>
      %187 = arith.divf %185, %186 : vector<16x1xf32>
      %188 = vector.broadcast %180 : vector<16x1xf32> to vector<16x32xf32>
      %189 = arith.subf %174, %188 : vector<16x32xf32>
      %cst_77 = arith.constant 9.99999997E-7 : f32
      %190 = vector.broadcast %cst_77 : f32 to vector<16x1xf32>
      %191 = arith.addf %187, %190 : vector<16x1xf32>
      %192 = math.rsqrt %191 : vector<16x1xf32>
      %193 = vector.broadcast %192 : vector<16x1xf32> to vector<16x32xf32>
      %194 = arith.mulf %189, %193 : vector<16x32xf32>
      %195 = vector.broadcast %175 : vector<1x32xf32> to vector<16x32xf32>
      %196 = arith.mulf %194, %195 : vector<16x32xf32>
      %197 = vector.broadcast %176 : vector<1x32xf32> to vector<16x32xf32>
      %198 = arith.addf %196, %197 : vector<16x32xf32>
      %199 = arith.truncf %198 : vector<16x32xf32> to vector<16x32xbf16>
      %c0_78 = arith.constant 0 : index
      %c0_79 = arith.constant 0 : index
      %200 = vector.load %arg5[%c0_78, %c0_79] : memref<32x96xbf16, #tpu.memory_space<vmem>>, vector<32x96xbf16>
      %cst_80 = arith.constant dense<0.000000e+00> : vector<16x96xf32>
      %201 = tpu.matmul %199, %200, %cst_80 {dimension_numbers = #tpu.dot_dimension_numbers<[1], [0], [0], [1], [0, 0, 1, 1], [], []>} : vector<16x32xbf16>, vector<32x96xbf16>, vector<16x96xf32> -> vector<16x96xf32>
      %c0_81 = arith.constant 0 : index
      %c0_82 = arith.constant 0 : index
      %202 = vector.load %arg6[%c0_81, %c0_82] : memref<1x96xf32, #tpu.memory_space<vmem>>, vector<1x96xf32>
      %203 = vector.broadcast %202 : vector<1x96xf32> to vector<16x96xf32>
      %204 = arith.addf %201, %203 : vector<16x96xf32>
      %c0_83 = arith.constant 0 : index
      %c0_84 = arith.constant 0 : index
      %205 = vector.load %arg17[%c0_83, %c0_84] : memref<16x96xf32, #tpu.memory_space<vmem>>, vector<16x96xf32>
      tpu.vector_store %arg17[%c0_83, %c0_84], %204 {strides = array<i32>} : memref<16x96xf32, #tpu.memory_space<vmem>>, vector<16x96xf32>,
      %c0_85 = arith.constant 0 : index
      %c0_86 = arith.constant 0 : index
      %c0_87 = arith.constant 0 : index
      %206 = vector.load %arg16[%c0_85, %c0_86, %c0_87] : memref<1x16x96xf32, #tpu.memory_space<vmem>>, vector<1x16x96xf32>
      %207 = vector.shape_cast %206 : vector<1x16x96xf32> to vector<16x96xf32>
      %208 = vector.shape_cast %204 : vector<16x96xf32> to vector<1x16x96xf32>
      tpu.vector_store %arg16[%c0_85, %c0_86, %c0_87], %208 {strides = array<i32>} : memref<1x16x96xf32, #tpu.memory_space<vmem>>, vector<1x16x96xf32>,
    } else {
    }
    %c8_i32 = arith.constant 8 : i32
    %3 = arith.muli %arg1, %c8_i32 : i32
    %4 = tpu.assume_multiple %3, 8 : i32
    %c0 = arith.constant 0 : index
    %5 = arith.index_cast %4 : i32 to index
    %c0_1 = arith.constant 0 : index
    %6 = vector.load %arg2[%c0, %5, %c0_1] : memref<1x16x32xf32, #tpu.memory_space<vmem>>, vector<1x8x32xf32>
    %7 = vector.shape_cast %6 : vector<1x8x32xf32> to vector<8x32xf32>
    %8 = arith.index_cast %4 : i32 to index
    %c0_2 = arith.constant 0 : index
    %9 = vector.load %arg17[%8, %c0_2] : memref<16x96xf32, #tpu.memory_space<vmem>>, vector<8x96xf32>
    %c0_3 = arith.constant 0 : index
    %c0_4 = arith.constant 0 : index
    %10 = vector.load %arg17[%c0_3, %c0_4] : memref<16x96xf32, #tpu.memory_space<vmem>>, vector<16x96xf32>
    %cst = arith.constant 0.000000e+00 : f32
    %11 = vector.broadcast %cst : f32 to vector<8x32xf32>
    %12 = vector.extract_strided_slice %9 {offsets = [0, 0], sizes = [8, 8], strides = [1, 1]} : vector<8x96xf32> to vector<8x8xf32>
    %cst_5 = arith.constant 0.353553385 : f32
    %13 = vector.broadcast %cst_5 : f32 to vector<8x8xf32>
    %14 = arith.mulf %12, %13 : vector<8x8xf32>
    %15 = arith.truncf %14 : vector<8x8xf32> to vector<8x8xbf16>
    %16 = vector.extract_strided_slice %10 {offsets = [0, 32], sizes = [16, 8], strides = [1, 1]} : vector<16x96xf32> to vector<16x8xf32>
    %17 = arith.truncf %16 : vector<16x8xf32> to vector<16x8xbf16>
    %18 = vector.extract_strided_slice %10 {offsets = [0, 64], sizes = [16, 8], strides = [1, 1]} : vector<16x96xf32> to vector<16x8xf32>
    %19 = arith.truncf %18 : vector<16x8xf32> to vector<16x8xbf16>
    "tpu.trace_start"() <{level = 10 : i32, message = "qd,kd->qk"}> : () -> ()
    %cst_6 = arith.constant dense<0.000000e+00> : vector<8x16xf32>
    %20 = tpu.matmul %15, %17, %cst_6 {dimension_numbers = #tpu.dot_dimension_numbers<[1], [1], [0], [0], [0, 0, 1, 0], [], []>} : vector<8x8xbf16>, vector<16x8xbf16>, vector<8x16xf32> -> vector<8x16xf32>
    "tpu.trace_stop"() : () -> ()
    %cst_7 = arith.constant dense<0xFF800000> : vector<8xf32>
    %21 = vector.multi_reduction <maximumf>, %20, %cst_7 [1] : vector<8x16xf32> to vector<8xf32>
    %22 = vector.shape_cast %21 : vector<8xf32> to vector<8x1xf32>
    %23 = vector.broadcast %22 : vector<8x1xf32> to vector<8x16xf32>
    %24 = arith.subf %20, %23 : vector<8x16xf32>
    %25 = math.exp %24 : vector<8x16xf32>
    %cst_8 = arith.constant dense<0.000000e+00> : vector<8xf32>
    %26 = vector.multi_reduction <add>, %25, %cst_8 [1] : vector<8x16xf32> to vector<8xf32>
    %27 = vector.shape_cast %26 : vector<8xf32> to vector<8x1xf32>
    %28 = tpu.reciprocal %27 {approx = true} : vector<8x1xf32> -> vector<8x1xf32>
    %29 = vector.broadcast %28 : vector<8x1xf32> to vector<8x16xf32>
    %30 = arith.mulf %25, %29 : vector<8x16xf32>
    %31 = arith.truncf %30 : vector<8x16xf32> to vector<8x16xbf16>
    %cst_9 = arith.constant dense<0.000000e+00> : vector<8x8xf32>
    %32 = tpu.matmul %31, %19, %cst_9 {dimension_numbers = #tpu.dot_dimension_numbers<[1], [0], [0], [1], [0, 0, 1, 1], [], []>} : vector<8x16xbf16>, vector<16x8xbf16>, vector<8x8xf32> -> vector<8x8xf32>
    %33 = arith.truncf %32 : vector<8x8xf32> to vector<8x8xbf16>
    %c0_10 = arith.constant 0 : index
    %c0_11 = arith.constant 0 : index
    %c0_12 = arith.constant 0 : index
    %34 = vector.load %arg7[%c0_10, %c0_11, %c0_12] : memref<4x8x32xbf16, #tpu.memory_space<vmem>>, vector<1x8x32xbf16>
    %35 = vector.shape_cast %34 : vector<1x8x32xbf16> to vector<8x32xbf16>
    %cst_13 = arith.constant dense<0.000000e+00> : vector<8x32xf32>
    %36 = tpu.matmul %33, %35, %cst_13 {dimension_numbers = #tpu.dot_dimension_numbers<[1], [0], [0], [1], [0, 0, 1, 1], [], []>} : vector<8x8xbf16>, vector<8x32xbf16>, vector<8x32xf32> -> vector<8x32xf32>
    %37 = arith.addf %11, %36 : vector<8x32xf32>
    %38 = vector.extract_strided_slice %9 {offsets = [0, 8], sizes = [8, 8], strides = [1, 1]} : vector<8x96xf32> to vector<8x8xf32>
    %cst_14 = arith.constant 0.353553385 : f32
    %39 = vector.broadcast %cst_14 : f32 to vector<8x8xf32>
    %40 = arith.mulf %38, %39 : vector<8x8xf32>
    %41 = arith.truncf %40 : vector<8x8xf32> to vector<8x8xbf16>
    %42 = vector.extract_strided_slice %10 {offsets = [0, 40], sizes = [16, 8], strides = [1, 1]} : vector<16x96xf32> to vector<16x8xf32>
    %43 = arith.truncf %42 : vector<16x8xf32> to vector<16x8xbf16>
    %44 = vector.extract_strided_slice %10 {offsets = [0, 72], sizes = [16, 8], strides = [1, 1]} : vector<16x96xf32> to vector<16x8xf32>
    %45 = arith.truncf %44 : vector<16x8xf32> to vector<16x8xbf16>
    "tpu.trace_start"() <{level = 10 : i32, message = "qd,kd->qk"}> : () -> ()
    %cst_15 = arith.constant dense<0.000000e+00> : vector<8x16xf32>
    %46 = tpu.matmul %41, %43, %cst_15 {dimension_numbers = #tpu.dot_dimension_numbers<[1], [1], [0], [0], [0, 0, 1, 0], [], []>} : vector<8x8xbf16>, vector<16x8xbf16>, vector<8x16xf32> -> vector<8x16xf32>
    "tpu.trace_stop"() : () -> ()
    %cst_16 = arith.constant dense<0xFF800000> : vector<8xf32>
    %47 = vector.multi_reduction <maximumf>, %46, %cst_16 [1] : vector<8x16xf32> to vector<8xf32>
    %48 = vector.shape_cast %47 : vector<8xf32> to vector<8x1xf32>
    %49 = vector.broadcast %48 : vector<8x1xf32> to vector<8x16xf32>
    %50 = arith.subf %46, %49 : vector<8x16xf32>
    %51 = math.exp %50 : vector<8x16xf32>
    %cst_17 = arith.constant dense<0.000000e+00> : vector<8xf32>
    %52 = vector.multi_reduction <add>, %51, %cst_17 [1] : vector<8x16xf32> to vector<8xf32>
    %53 = vector.shape_cast %52 : vector<8xf32> to vector<8x1xf32>
    %54 = tpu.reciprocal %53 {approx = true} : vector<8x1xf32> -> vector<8x1xf32>
    %55 = vector.broadcast %54 : vector<8x1xf32> to vector<8x16xf32>
    %56 = arith.mulf %51, %55 : vector<8x16xf32>
    %57 = arith.truncf %56 : vector<8x16xf32> to vector<8x16xbf16>
    %cst_18 = arith.constant dense<0.000000e+00> : vector<8x8xf32>
    %58 = tpu.matmul %57, %45, %cst_18 {dimension_numbers = #tpu.dot_dimension_numbers<[1], [0], [0], [1], [0, 0, 1, 1], [], []>} : vector<8x16xbf16>, vector<16x8xbf16>, vector<8x8xf32> -> vector<8x8xf32>
    %59 = arith.truncf %58 : vector<8x8xf32> to vector<8x8xbf16>
    %c1 = arith.constant 1 : index
    %c0_19 = arith.constant 0 : index
    %c0_20 = arith.constant 0 : index
    %60 = vector.load %arg7[%c1, %c0_19, %c0_20] : memref<4x8x32xbf16, #tpu.memory_space<vmem>>, vector<1x8x32xbf16>
    %61 = vector.shape_cast %60 : vector<1x8x32xbf16> to vector<8x32xbf16>
    %cst_21 = arith.constant dense<0.000000e+00> : vector<8x32xf32>
    %62 = tpu.matmul %59, %61, %cst_21 {dimension_numbers = #tpu.dot_dimension_numbers<[1], [0], [0], [1], [0, 0, 1, 1], [], []>} : vector<8x8xbf16>, vector<8x32xbf16>, vector<8x32xf32> -> vector<8x32xf32>
    %63 = arith.addf %37, %62 : vector<8x32xf32>
    %64 = vector.extract_strided_slice %9 {offsets = [0, 16], sizes = [8, 8], strides = [1, 1]} : vector<8x96xf32> to vector<8x8xf32>
    %cst_22 = arith.constant 0.353553385 : f32
    %65 = vector.broadcast %cst_22 : f32 to vector<8x8xf32>
    %66 = arith.mulf %64, %65 : vector<8x8xf32>
    %67 = arith.truncf %66 : vector<8x8xf32> to vector<8x8xbf16>
    %68 = vector.extract_strided_slice %10 {offsets = [0, 48], sizes = [16, 8], strides = [1, 1]} : vector<16x96xf32> to vector<16x8xf32>
    %69 = arith.truncf %68 : vector<16x8xf32> to vector<16x8xbf16>
    %70 = vector.extract_strided_slice %10 {offsets = [0, 80], sizes = [16, 8], strides = [1, 1]} : vector<16x96xf32> to vector<16x8xf32>
    %71 = arith.truncf %70 : vector<16x8xf32> to vector<16x8xbf16>
    "tpu.trace_start"() <{level = 10 : i32, message = "qd,kd->qk"}> : () -> ()
    %cst_23 = arith.constant dense<0.000000e+00> : vector<8x16xf32>
    %72 = tpu.matmul %67, %69, %cst_23 {dimension_numbers = #tpu.dot_dimension_numbers<[1], [1], [0], [0], [0, 0, 1, 0], [], []>} : vector<8x8xbf16>, vector<16x8xbf16>, vector<8x16xf32> -> vector<8x16xf32>
    "tpu.trace_stop"() : () -> ()
    %cst_24 = arith.constant dense<0xFF800000> : vector<8xf32>
    %73 = vector.multi_reduction <maximumf>, %72, %cst_24 [1] : vector<8x16xf32> to vector<8xf32>
    %74 = vector.shape_cast %73 : vector<8xf32> to vector<8x1xf32>
    %75 = vector.broadcast %74 : vector<8x1xf32> to vector<8x16xf32>
    %76 = arith.subf %72, %75 : vector<8x16xf32>
    %77 = math.exp %76 : vector<8x16xf32>
    %cst_25 = arith.constant dense<0.000000e+00> : vector<8xf32>
    %78 = vector.multi_reduction <add>, %77, %cst_25 [1] : vector<8x16xf32> to vector<8xf32>
    %79 = vector.shape_cast %78 : vector<8xf32> to vector<8x1xf32>
    %80 = tpu.reciprocal %79 {approx = true} : vector<8x1xf32> -> vector<8x1xf32>
    %81 = vector.broadcast %80 : vector<8x1xf32> to vector<8x16xf32>
    %82 = arith.mulf %77, %81 : vector<8x16xf32>
    %83 = arith.truncf %82 : vector<8x16xf32> to vector<8x16xbf16>
    %cst_26 = arith.constant dense<0.000000e+00> : vector<8x8xf32>
    %84 = tpu.matmul %83, %71, %cst_26 {dimension_numbers = #tpu.dot_dimension_numbers<[1], [0], [0], [1], [0, 0, 1, 1], [], []>} : vector<8x16xbf16>, vector<16x8xbf16>, vector<8x8xf32> -> vector<8x8xf32>
    %85 = arith.truncf %84 : vector<8x8xf32> to vector<8x8xbf16>
    %c2 = arith.constant 2 : index
    %c0_27 = arith.constant 0 : index
    %c0_28 = arith.constant 0 : index
    %86 = vector.load %arg7[%c2, %c0_27, %c0_28] : memref<4x8x32xbf16, #tpu.memory_space<vmem>>, vector<1x8x32xbf16>
    %87 = vector.shape_cast %86 : vector<1x8x32xbf16> to vector<8x32xbf16>
    %cst_29 = arith.constant dense<0.000000e+00> : vector<8x32xf32>
    %88 = tpu.matmul %85, %87, %cst_29 {dimension_numbers = #tpu.dot_dimension_numbers<[1], [0], [0], [1], [0, 0, 1, 1], [], []>} : vector<8x8xbf16>, vector<8x32xbf16>, vector<8x32xf32> -> vector<8x32xf32>
    %89 = arith.addf %63, %88 : vector<8x32xf32>
    %90 = vector.extract_strided_slice %9 {offsets = [0, 24], sizes = [8, 8], strides = [1, 1]} : vector<8x96xf32> to vector<8x8xf32>
    %cst_30 = arith.constant 0.353553385 : f32
    %91 = vector.broadcast %cst_30 : f32 to vector<8x8xf32>
    %92 = arith.mulf %90, %91 : vector<8x8xf32>
    %93 = arith.truncf %92 : vector<8x8xf32> to vector<8x8xbf16>
    %94 = vector.extract_strided_slice %10 {offsets = [0, 56], sizes = [16, 8], strides = [1, 1]} : vector<16x96xf32> to vector<16x8xf32>
    %95 = arith.truncf %94 : vector<16x8xf32> to vector<16x8xbf16>
    %96 = vector.extract_strided_slice %10 {offsets = [0, 88], sizes = [16, 8], strides = [1, 1]} : vector<16x96xf32> to vector<16x8xf32>
    %97 = arith.truncf %96 : vector<16x8xf32> to vector<16x8xbf16>
    "tpu.trace_start"() <{level = 10 : i32, message = "qd,kd->qk"}> : () -> ()
    %cst_31 = arith.constant dense<0.000000e+00> : vector<8x16xf32>
    %98 = tpu.matmul %93, %95, %cst_31 {dimension_numbers = #tpu.dot_dimension_numbers<[1], [1], [0], [0], [0, 0, 1, 0], [], []>} : vector<8x8xbf16>, vector<16x8xbf16>, vector<8x16xf32> -> vector<8x16xf32>
    "tpu.trace_stop"() : () -> ()
    %cst_32 = arith.constant dense<0xFF800000> : vector<8xf32>
    %99 = vector.multi_reduction <maximumf>, %98, %cst_32 [1] : vector<8x16xf32> to vector<8xf32>
    %100 = vector.shape_cast %99 : vector<8xf32> to vector<8x1xf32>
    %101 = vector.broadcast %100 : vector<8x1xf32> to vector<8x16xf32>
    %102 = arith.subf %98, %101 : vector<8x16xf32>
    %103 = math.exp %102 : vector<8x16xf32>
    %cst_33 = arith.constant dense<0.000000e+00> : vector<8xf32>
    %104 = vector.multi_reduction <add>, %103, %cst_33 [1] : vector<8x16xf32> to vector<8xf32>
    %105 = vector.shape_cast %104 : vector<8xf32> to vector<8x1xf32>
    %106 = tpu.reciprocal %105 {approx = true} : vector<8x1xf32> -> vector<8x1xf32>
    %107 = vector.broadcast %106 : vector<8x1xf32> to vector<8x16xf32>
    %108 = arith.mulf %103, %107 : vector<8x16xf32>
    %109 = arith.truncf %108 : vector<8x16xf32> to vector<8x16xbf16>
    %cst_34 = arith.constant dense<0.000000e+00> : vector<8x8xf32>
    %110 = tpu.matmul %109, %97, %cst_34 {dimension_numbers = #tpu.dot_dimension_numbers<[1], [0], [0], [1], [0, 0, 1, 1], [], []>} : vector<8x16xbf16>, vector<16x8xbf16>, vector<8x8xf32> -> vector<8x8xf32>
    %111 = arith.truncf %110 : vector<8x8xf32> to vector<8x8xbf16>
    %c3 = arith.constant 3 : index
    %c0_35 = arith.constant 0 : index
    %c0_36 = arith.constant 0 : index
    %112 = vector.load %arg7[%c3, %c0_35, %c0_36] : memref<4x8x32xbf16, #tpu.memory_space<vmem>>, vector<1x8x32xbf16>
    %113 = vector.shape_cast %112 : vector<1x8x32xbf16> to vector<8x32xbf16>
    %cst_37 = arith.constant dense<0.000000e+00> : vector<8x32xf32>
    %114 = tpu.matmul %111, %113, %cst_37 {dimension_numbers = #tpu.dot_dimension_numbers<[1], [0], [0], [1], [0, 0, 1, 1], [], []>} : vector<8x8xbf16>, vector<8x32xbf16>, vector<8x32xf32> -> vector<8x32xf32>
    %115 = arith.addf %89, %114 : vector<8x32xf32>
    %116 = arith.addf %7, %115 : vector<8x32xf32>
    %c0_38 = arith.constant 0 : index
    %c0_39 = arith.constant 0 : index
    %117 = vector.load %arg8[%c0_38, %c0_39] : memref<1x32xf32, #tpu.memory_space<vmem>>, vector<1x32xf32>
    %118 = vector.broadcast %117 : vector<1x32xf32> to vector<8x32xf32>
    %119 = arith.addf %116, %118 : vector<8x32xf32>
    %c0_40 = arith.constant 0 : index
    %c0_41 = arith.constant 0 : index
    %120 = vector.load %arg9[%c0_40, %c0_41] : memref<1x32xf32, #tpu.memory_space<vmem>>, vector<1x32xf32>
    %c0_42 = arith.constant 0 : index
    %c0_43 = arith.constant 0 : index
    %121 = vector.load %arg10[%c0_42, %c0_43] : memref<1x32xf32, #tpu.memory_space<vmem>>, vector<1x32xf32>
    %cst_44 = arith.constant dense<0.000000e+00> : vector<8xf32>
    %122 = vector.multi_reduction <add>, %119, %cst_44 [1] : vector<8x32xf32> to vector<8xf32>
    %123 = vector.shape_cast %122 : vector<8xf32> to vector<8x1xf32>
    %cst_45 = arith.constant 3.200000e+01 : f32
    %124 = vector.broadcast %cst_45 : f32 to vector<8x1xf32>
    %125 = arith.divf %123, %124 : vector<8x1xf32>
    %126 = vector.broadcast %125 : vector<8x1xf32> to vector<8x32xf32>
    %127 = arith.subf %119, %126 : vector<8x32xf32>
    %128 = arith.mulf %127, %127 : vector<8x32xf32>
    %cst_46 = arith.constant dense<0.000000e+00> : vector<8xf32>
    %129 = vector.multi_reduction <add>, %128, %cst_46 [1] : vector<8x32xf32> to vector<8xf32>
    %130 = vector.shape_cast %129 : vector<8xf32> to vector<8x1xf32>
    %cst_47 = arith.constant 3.200000e+01 : f32
    %131 = vector.broadcast %cst_47 : f32 to vector<8x1xf32>
    %132 = arith.divf %130, %131 : vector<8x1xf32>
    %133 = vector.broadcast %125 : vector<8x1xf32> to vector<8x32xf32>
    %134 = arith.subf %119, %133 : vector<8x32xf32>
    %cst_48 = arith.constant 9.99999997E-7 : f32
    %135 = vector.broadcast %cst_48 : f32 to vector<8x1xf32>
    %136 = arith.addf %132, %135 : vector<8x1xf32>
    %137 = math.rsqrt %136 : vector<8x1xf32>
    %138 = vector.broadcast %137 : vector<8x1xf32> to vector<8x32xf32>
    %139 = arith.mulf %134, %138 : vector<8x32xf32>
    %140 = vector.broadcast %120 : vector<1x32xf32> to vector<8x32xf32>
    %141 = arith.mulf %139, %140 : vector<8x32xf32>
    %142 = vector.broadcast %121 : vector<1x32xf32> to vector<8x32xf32>
    %143 = arith.addf %141, %142 : vector<8x32xf32>
    %144 = arith.truncf %143 : vector<8x32xf32> to vector<8x32xbf16>
    %c0_49 = arith.constant 0 : index
    %c0_50 = arith.constant 0 : index
    %145 = vector.load %arg11[%c0_49, %c0_50] : memref<32x128xbf16, #tpu.memory_space<vmem>>, vector<32x128xbf16>
    %cst_51 = arith.constant dense<0.000000e+00> : vector<8x128xf32>
    %146 = tpu.matmul %144, %145, %cst_51 {dimension_numbers = #tpu.dot_dimension_numbers<[1], [0], [0], [1], [0, 0, 1, 1], [], []>} : vector<8x32xbf16>, vector<32x128xbf16>, vector<8x128xf32> -> vector<8x128xf32>
    %c0_52 = arith.constant 0 : index
    %c0_53 = arith.constant 0 : index
    %147 = vector.load %arg12[%c0_52, %c0_53] : memref<1x128xf32, #tpu.memory_space<vmem>>, vector<1x128xf32>
    %148 = vector.broadcast %147 : vector<1x128xf32> to vector<8x128xf32>
    %149 = arith.addf %146, %148 : vector<8x128xf32>
    %150 = arith.mulf %149, %149 : vector<8x128xf32>
    %151 = arith.mulf %149, %150 : vector<8x128xf32>
    %cst_54 = arith.constant 4.471500e-02 : f32
    %152 = vector.broadcast %cst_54 : f32 to vector<8x128xf32>
    %153 = arith.mulf %152, %151 : vector<8x128xf32>
    %154 = arith.addf %149, %153 : vector<8x128xf32>
    %cst_55 = arith.constant 0.797884583 : f32
    %155 = vector.broadcast %cst_55 : f32 to vector<8x128xf32>
    %156 = arith.mulf %155, %154 : vector<8x128xf32>
    %157 = math.tanh %156 : vector<8x128xf32>
    %cst_56 = arith.constant 1.000000e+00 : f32
    %158 = vector.broadcast %cst_56 : f32 to vector<8x128xf32>
    %159 = arith.addf %158, %157 : vector<8x128xf32>
    %cst_57 = arith.constant 5.000000e-01 : f32
    %160 = vector.broadcast %cst_57 : f32 to vector<8x128xf32>
    %161 = arith.mulf %160, %159 : vector<8x128xf32>
    %162 = arith.mulf %149, %161 : vector<8x128xf32>
    %163 = arith.truncf %162 : vector<8x128xf32> to vector<8x128xbf16>
    %c0_58 = arith.constant 0 : index
    %c0_59 = arith.constant 0 : index
    %164 = vector.load %arg13[%c0_58, %c0_59] : memref<128x32xbf16, #tpu.memory_space<vmem>>, vector<128x32xbf16>
    %cst_60 = arith.constant dense<0.000000e+00> : vector<8x32xf32>
    %165 = tpu.matmul %163, %164, %cst_60 {dimension_numbers = #tpu.dot_dimension_numbers<[1], [0], [0], [1], [0, 0, 1, 1], [], []>} : vector<8x128xbf16>, vector<128x32xbf16>, vector<8x32xf32> -> vector<8x32xf32>
    %c0_61 = arith.constant 0 : index
    %c0_62 = arith.constant 0 : index
    %166 = vector.load %arg14[%c0_61, %c0_62] : memref<1x32xf32, #tpu.memory_space<vmem>>, vector<1x32xf32>
    %167 = vector.broadcast %166 : vector<1x32xf32> to vector<8x32xf32>
    %168 = arith.addf %165, %167 : vector<8x32xf32>
    %169 = arith.addf %119, %168 : vector<8x32xf32>
    %c0_63 = arith.constant 0 : index
    %c0_64 = arith.constant 0 : index
    %c0_65 = arith.constant 0 : index
    %170 = vector.load %arg15[%c0_63, %c0_64, %c0_65] : memref<1x8x32xf32, #tpu.memory_space<vmem>>, vector<1x8x32xf32>
    %171 = vector.shape_cast %170 : vector<1x8x32xf32> to vector<8x32xf32>
    %172 = vector.shape_cast %169 : vector<8x32xf32> to vector<1x8x32xf32>
    tpu.vector_store %arg15[%c0_63, %c0_64, %c0_65], %172 {strides = array<i32>} : memref<1x8x32xf32, #tpu.memory_space<vmem>>, vector<1x8x32xf32>,
    return
  }
  func.func @transform_0(%arg0: i32, %arg1: i32) -> (i32, i32, i32) {
    %c0_i32 = arith.constant 0 : i32
    %c0_i32_0 = arith.constant 0 : i32
    %c0_i32_1 = arith.constant 0 : i32
    return %arg0, %c0_i32, %c0_i32_0 : i32, i32, i32
  }
  func.func @transform_1(%arg0: i32, %arg1: i32) -> (i32, i32) {
    %c0_i32 = arith.constant 0 : i32
    %c0_i32_0 = arith.constant 0 : i32
    %c0_i32_1 = arith.constant 0 : i32
    return %c0_i32, %c0_i32_0 : i32, i32
  }
  func.func @transform_2(%arg0: i32, %arg1: i32) -> (i32, i32) {
    %c0_i32 = arith.constant 0 : i32
    %c0_i32_0 = arith.constant 0 : i32
    %c0_i32_1 = arith.constant 0 : i32
    return %c0_i32, %c0_i32_0 : i32, i32
  }
  func.func @transform_3(%arg0: i32, %arg1: i32) -> (i32, i32) {
    %c0_i32 = arith.constant 0 : i32
    %c0_i32_0 = arith.constant 0 : i32
    %c0_i32_1 = arith.constant 0 : i32
    return %c0_i32, %c0_i32_0 : i32, i32
  }
  func.func @transform_4(%arg0: i32, %arg1: i32) -> (i32, i32) {
    %c0_i32 = arith.constant 0 : i32
    %c0_i32_0 = arith.constant 0 : i32
    %c0_i32_1 = arith.constant 0 : i32
    return %c0_i32, %c0_i32_0 : i32, i32
  }
  func.func @transform_5(%arg0: i32, %arg1: i32) -> (i32, i32, i32) {
    %c0_i32 = arith.constant 0 : i32
    %c0_i32_0 = arith.constant 0 : i32
    %c0_i32_1 = arith.constant 0 : i32
    %c0_i32_2 = arith.constant 0 : i32
    return %c0_i32, %c0_i32_0, %c0_i32_1 : i32, i32, i32
  }
  func.func @transform_6(%arg0: i32, %arg1: i32) -> (i32, i32) {
    %c0_i32 = arith.constant 0 : i32
    %c0_i32_0 = arith.constant 0 : i32
    %c0_i32_1 = arith.constant 0 : i32
    return %c0_i32, %c0_i32_0 : i32, i32
  }
  func.func @transform_7(%arg0: i32, %arg1: i32) -> (i32, i32) {
    %c0_i32 = arith.constant 0 : i32
    %c0_i32_0 = arith.constant 0 : i32
    %c0_i32_1 = arith.constant 0 : i32
    return %c0_i32, %c0_i32_0 : i32, i32
  }
  func.func @transform_8(%arg0: i32, %arg1: i32) -> (i32, i32) {
    %c0_i32 = arith.constant 0 : i32
    %c0_i32_0 = arith.constant 0 : i32
    %c0_i32_1 = arith.constant 0 : i32
    return %c0_i32, %c0_i32_0 : i32, i32
  }
  func.func @transform_9(%arg0: i32, %arg1: i32) -> (i32, i32) {
    %c0_i32 = arith.constant 0 : i32
    %c0_i32_0 = arith.constant 0 : i32
    %c0_i32_1 = arith.constant 0 : i32
    return %c0_i32, %c0_i32_0 : i32, i32
  }
  func.func @transform_10(%arg0: i32, %arg1: i32) -> (i32, i32) {
    %c0_i32 = arith.constant 0 : i32
    %c0_i32_0 = arith.constant 0 : i32
    %c0_i32_1 = arith.constant 0 : i32
    return %c0_i32, %c0_i32_0 : i32, i32
  }
  func.func @transform_11(%arg0: i32, %arg1: i32) -> (i32, i32) {
    %c0_i32 = arith.constant 0 : i32
    %c0_i32_0 = arith.constant 0 : i32
    %c0_i32_1 = arith.constant 0 : i32
    return %c0_i32, %c0_i32_0 : i32, i32
  }
  func.func @transform_12(%arg0: i32, %arg1: i32) -> (i32, i32) {
    %c0_i32 = arith.constant 0 : i32
    %c0_i32_0 = arith.constant 0 : i32
    %c0_i32_1 = arith.constant 0 : i32
    return %c0_i32, %c0_i32_0 : i32, i32
  }
  func.func @transform_13(%arg0: i32, %arg1: i32) -> (i32, i32, i32) {
    %c0_i32 = arith.constant 0 : i32
    %c0_i32_0 = arith.constant 0 : i32
    return %arg0, %arg1, %c0_i32 : i32, i32, i32
  }
  func.func @transform_14(%arg0: i32, %arg1: i32) -> (i32, i32, i32) {
    %c0_i32 = arith.constant 0 : i32
    %c0_i32_0 = arith.constant 0 : i32
    %c0_i32_1 = arith.constant 0 : i32
    return %arg0, %c0_i32, %c0_i32_0 : i32, i32, i32
  }
}

</mosaic_0001>

<bundles_post_ra>
// kernel: transformer_block.1
= control target key start
LH: loop header
LB: loop body
LE: loop exit
PB: predicated region body
PF: predicated region fallthrough
CT: control target
= control target key end

     0   :  { %s2475_s0 = inlined_call_operand.vmem [shape: f32[2,16,32], index: 0, kind: input, shape index: {}]   ;;  %s2476_s1 = inlined_call_operand.vmem [shape: f32[1,32], index: 1, kind: input, shape index: {}]   ;;  %s2477_s2 = inlined_call_operand.vmem [shape: f32[1,32], index: 2, kind: input, shape index: {}]   ;;  %s2478_s3 = inlined_call_operand.vmem [shape: bf16[32,96], index: 3, kind: input, shape index: {}]   ;;  %s2479_s4 = inlined_call_operand.vmem [shape: f32[1,96], index: 4, kind: input, shape index: {}]   ;;  %s2480_s5 = inlined_call_operand.vmem [shape: bf16[4,8,32], index: 5, kind: input, shape index: {}]   ;;  %s2481_s6 = inlined_call_operand.vmem [shape: f32[1,32], index: 6, kind: input, shape index: {}]   ;;  %s2482_s7 = inlined_call_operand.vmem [shape: f32[1,32], index: 7, kind: input, shape index: {}]   ;;  %s2483_s8 = inlined_call_operand.vmem [shape: f32[1,32], index: 8, kind: input, shape index: {}]   ;;  %s2484_s9 = inlined_call_operand.vmem [shape: bf16[32,128], index: 9, kind: input, shape index: {}]   ;;  %s2485_s10 = inlined_call_operand.vmem [shape: f32[1,128], index: 10, kind: input, shape index: {}]   ;;  %s2486_s11 = inlined_call_operand.vmem [shape: bf16[128,32], index: 11, kind: input, shape index: {}]   ;;  %s2487_s12 = inlined_call_operand.vmem [shape: f32[1,32], index: 12, kind: input, shape index: {}]   ;;  %s2488_s13 = inlined_call_operand.hbm [shape: f32[2,16,32], index: 13, kind: output, shape index: {0}]   ;;  %s2489_s14 = inlined_call_operand.vmem [shape: f32[2,16,96], index: 14, kind: output, shape index: {1}]  }
   0x1   :  { %2498 = sst [smem:[#allocation13_spill]] %s2475_s0 }
   0x2   :  { %2499 = sst [smem:[#allocation14_spill]] %s2488_s13 }
   0x3   :  { %20 = vsyncpa [#allocation4], 0 }
   0x4   :  { %22 = vsyncpa [#allocation4 + $0x1], 0  ;;  %s2126_s29 = smov 0   ;;  %s2128_s30 = smov 0  }
   0x5   :  { %s2130_s15 = smov 0   ;;  %s2132_s16 = smov 0  }
   0x6   :  { %s2134_s17 = smov 0   ;;  %s2136_s18 = smov 0  }
   0x7   :  { %s2138_s19 = smov 0   ;;  %s2140_s20 = smov 0  }
   0x8 LB: > { %2500 = sst [smem:[#allocation6_spill]] %s2005_s29  ;;  %s1616_s21 = sadd.s32 4294967295, %s2033_s20   ;;  %s2033_s20 = sphi %s2140_s20, %s28_s20   ;;  %s2029_s19 = sphi %s2138_s19, %s2518_s19   ;;  %s2025_s18 = sphi %s2136_s18, %s2517_s18   ;;  %s2021_s17 = sphi %s2134_s17, %s2516_s17   ;;  %s2017_s16 = sphi %s2132_s16, %s2515_s16   ;;  %s2013_s15 = sphi %s2130_s15, %s2521_s15   ;;  %s2009_s30 = sphi %s2128_s30, %s2520_s30   ;;  %s2005_s29 = sphi %s2126_s29, %s2519_s29  }
   0x9   : > { %2501 = sst [smem:[#allocation7_spill]] %s2025_s18  ;;  %s1617_s22 = sadd.s32 4294967294, %s2033_s20  }
   0xa   : > { %2502 = sst [smem:[#allocation8_spill]] %s2029_s19  ;;  %s37_s23 = sadd.s32 1, %s2025_s18 }
   0xb   : > { %p38_p0 = scmp.ge.s32.totalorder %s37_s23, 2  ;;  %s40_s24 = sadd.s32 1, %s2029_s19 }
   0xc   : > { %p337_p1 = scmp.ne.s32.totalorder %s2013_s15, %s2009_s30  ;;  %p338_p2 = scmp.eq.s32.totalorder %s1616_s21, 3 }
   0xd   : > { %s2523_s23 = smov (%p38_p0, %s37_s23), 0  ;;  %s2525_s24 = smov (!%p38_p0, %s40_s24), %s2029_s19 }
   0xe   : > { %2503 = sst [smem:[#allocation9_spill]] %s2523_s23  ;;  %s323_s25 = ssub.s32 %s2025_s18, %s2523_s23 }
   0xf   : > { %p2177_p3 = por %p338_p2, %p337_p1  ;;  %p42_p4 = scmp.ge.s32.totalorder %s2525_s24, 2 }
  0x10   : > { %p343_p5 = scmp.ne.s32.totalorder %s2009_s30, %s2005_s29  ;;  %p344_p6 = scmp.eq.s32.totalorder %s1617_s22, 3 }
  0x11   : > { %p1620_p7 = scmp.ge.s32.totalorder %s2033_s20, 1  ;;  %s2527_s24 = smov (%p42_p4, %s2525_s24), 0 }
  0x12   : > { %2505 = sst [smem:[#allocation10_spill]] %s2527_s24  ;;  %p2186_p8 = por %p344_p6, %p343_p5 }
  0x13   : > { %p432_p9 = scmp.lt.s32.totalorder %s2033_s20, 5  ;;  %s322_s28 = ssub.s32 %s2029_s19, %s2527_s24 }
  0x14   : > { %s2506_s27 = scalar_select %p2186_p8, 1, 0 }
  0x15   : > { %s327_s21 = sadd.s32 1, %s2013_s15  ;;  %s324_s13 = sor.u32 %s323_s25, %s322_s28 }
  0x16   : > { %2507 = sst [smem:[#allocation11_spill]] %s2506_s27  ;;  %p433_p10 = pnand %p1620_p7, %p432_p9 }
  0x17   : > { %p325_p11 = scmp.eq.s32.totalorder %s324_s13, 0  ;;  %s2497_s22 = sand.u32 (!%p433_p10), 1, %s2009_s30  }
  0x18   : > { %436 = sbr.rel (%p433_p10) target bundleno = 4071 (0xfe7), region = 72  ;;  %p483_p12 = scmp.lt.s32.totalorder (!%p433_p10), %s2021_s17, 1 }
  0x19   : > { %s2195_s23 = scalar_select %p325_p11, %s2013_s15, %s327_s21  }
  0x1a   : > { %s2201_s18 = sshll.u32 (!%p433_p10), %s2497_s22, 3  ;;  %s2509_s0 = sld [smem:[#allocation13_spill]] (!%p433_p10) }
  0x1b   : > { %2508 = sst [smem:[#allocation12_spill]] %s2195_s23  ;;  %s475_s23 = scalar_lea.vmem (!%p433_p10), [#allocation3], %s2201_s18 }
  0x1c   : > { %p1626_p13 = scmp.ne.s32.totalorder (!%p433_p10), %s2017_s16, 0 }
  0x1d   : > { %s484_s27 = scalar_select %p483_p12, %s2021_s17, 1 }
  0x1e   : > { %497 = sbr.rel (%p1626_p13) target bundleno = 550 (0x226), region = 76 }
  0x1f   : > { %s1670_s29 = sshll.u32 %s484_s27, 4 }
  0x20   : > { %s2207_s25 = scalar_lea.vmem %s2509_s0, %s1670_s29  ;;  %s2212_s21 = scalar_lea.vmem %s2489_s14, %s1670_s29 }
  0x23   : > { %v498_v0 = vld [vmem:[%s2207_s25] sm:$0xff]  ;;  %vm502_vm0 = vcmask 261120   ;;  %v499_v1 = vld [vmem:[%s2207_s25 + $0x8] sm:$0xff]  ;;  %v2035_v15 = vmov 0.0   ;;  %vm2036_vm1 = vmmov 0   ;;  %vm614_vm2 = vcmask 785408  }
  0x24   : > { %v503_v2 = vsel %vm502_vm0, %v498_v0, 0.0  ;;  %v506_v3 = vsel %vm502_vm0, %v499_v1, 0.0  ;;  %v1905_v14 = vld [vmem:[%s2478_s3 + $0x8] sm:$0xff]   ;;  %1711 = vmatprep.subr.bf16.mxu0 %v2035_v15  ;;  %1715 = vmatprep.mubr.msk.bf16.mxu0 %vm2036_vm1, %v2035_v15  ;;  %v1906_v16 = vld [vmem:[%s2478_s3] sm:$0xff]  }
  0x25   : > { %504 = vadd.xlane.f32.xlu0 %v503_v2  ;;  %1712 = vmatpush3.bf16.msra.mxu0 %v1905_v14  ;;  %v1627_v25 = vld [vmem:[%s2476_s1] ss:$0 sm:$0xff] }
  0x26   : > { %1713 = vmatprep.subr.bf16.mxu0 %v2035_v15  ;;  %v1628_v29 = vld [vmem:[%s2477_s2] ss:$0 sm:$0xff] }
  0x27   : > { %v1629_v34 = vld [vmem:[%s2479_s4] ss:$0 sm:$0xff] }
  0x29   : > { %507 = vadd.xlane.f32.xlu0 %v506_v3  ;;  %1714 = vmatpush3.bf16.msra.mxu0 %v1906_v16 }
  0xae   : > { %v505_v4 = vpop.xlane.xlu0 %504 }
  0xaf   : > { %v510_v5 = vmul.f32 0.03125, %v505_v4 }
  0xb1   : > { %v512_v6 = vsub.f32 %v498_v0, %v510_v5 }
  0xb2   : > { %v508_v7 = vpop.xlane.xlu0 %507 }
  0xb3   : > { %v511_v8 = vmul.f32 0.03125, %v508_v7  ;;  %v514_v9 = vmul.f32 %v512_v6, %v512_v6 }
  0xb5   : > { %v513_v10 = vsub.f32 %v499_v1, %v511_v8  ;;  %v516_v11 = vsel %vm502_vm0, %v514_v9, 0.0 }
  0xb6   : > { %517 = vadd.xlane.f32.xlu1 %v516_v11 }
  0xb7   : > { %v515_v12 = vmul.f32 %v513_v10, %v513_v10 }
  0xb9   : > { %v519_v13 = vsel %vm502_vm0, %v515_v12, 0.0 }
  0xba   : > { %520 = vadd.xlane.f32.xlu1 %v519_v13 }
 0x13f   : > { %v518_v17 = vpop.xlane.xlu1 %517 }
 0x140   : > { %v522_v18 = vmul.f32 0.03125, %v518_v17 }
 0x142   : > { %v524_v19 = vadd.f32 1e-06, %v522_v18 }
 0x143   : > { %v521_v20 = vpop.xlane.xlu1 %520 }
 0x144   : > { %1907 = vrsqrt.f32 %v524_v19  ;;  %v523_v21 = vmul.f32 0.03125, %v521_v20 }
 0x146   : > { %v525_v22 = vadd.f32 1e-06, %v523_v21 }
 0x148   : > { %1909 = vrsqrt.f32 %v525_v22 }
 0x151   : > { %v1908_v23 = vpop.eup %1907 }
 0x152   : > { %v528_v24 = vmul.f32 %v1908_v23, %v512_v6 }
 0x154   : > { %v536_v28 = vmul.f32 %v1627_v25, %v528_v24 }
 0x155   : > { %v1910_v26 = vpop.eup %1909 }
 0x156   : > { %v529_v27 = vmul.f32 %v1910_v26, %v513_v10  ;;  %v544_v31 = vadd.f32 %v1628_v29, %v536_v28 }
 0x158   : > { %v537_v30 = vmul.f32 %v1627_v25, %v529_v27 }
 0x15a   : > { %v545_v32 = vadd.f32 %v1628_v29, %v537_v30 }
 0x15c   : > { %v546_v33 = vpack.c.bf16 %v545_v32, %v544_v31 }
 0x15e   : > { %1716 = vmatmul.mubr.msk.bf16.vlgmr.msra.gmra.mxu0 %vm502_vm0, %v546_v33 }
 0x21e   : > { %v607_v35 = vpop.f32.mrf.mxu0 }
 0x21f   : > { %v608_v36 = vadd.f32 %v1629_v34, %v607_v35 }
 0x220   : > { %v1717_v37 = vpop.f32.mrf.mxu0 }
 0x221   : > { %615 = vst.msk [vmem:[#allocation2] sm:$0xff] %vm614_vm2, %v608_v36  ;;  %617 = vst.msk [vmem:[%s2212_s21] sm:$0xff] %vm614_vm2, %v608_v36 }
 0x222   : > { %v610_v38 = vpop.f32.mrf.mxu0 }
 0x223   : > { %v611_v39 = vadd.f32 %v1629_v34, %v610_v38 }
 0x224   : > { %v1718_v40 = vpop.f32.mrf.mxu0 }
 0x225   : > { %616 = vst.msk [vmem:[#allocation2 + $0x8] sm:$0xff] %vm614_vm2, %v611_v39  ;;  %618 = vst.msk [vmem:[%s2212_s21 + $0x8] sm:$0xff] %vm614_vm2, %v611_v39 }
 0x226 PF: > { %v2037_v44 = vmov 0.0   ;;  %vm2038_vm3 = vmmov 0   ;;  %s2039_s21 = smov 96   ;;  %s1633_s13 = sshll.u32 %s2017_s16, 3  ;;  %vm632_vm4 = vcmask 64512   ;;  %vm679_vm5 = vcmask 130048  }
 0x227   : > { %1719 = vmatprep.subr.bf16.mxu1 %v2037_v44  ;;  %1721 = vmatprep.mubr.msk.bf16.mxu1 %vm2038_vm3, %v2037_v44  ;;  %s622_s28 = scalar_lea.vmem [#allocation2], %s1633_s13  ;;  %s2040_s29 = smov 64   ;;  %vm855_vm6 = vcmask 1043456   ;;  %v1638_v18 = vld [vmem:[%s2480_s5 + $0x4] sm:$0xf]  ;;  %vm1272_vm7 = vcmask 261120  }
 0x228   : > { %v624_v41 = vld [vmem:[#allocation2] sm:$0xff]  ;;  %1737 = vmatprep.subr.bf16.mxu0 %v2037_v44  ;;  %1739 = vmatprep.mubr.msk.bf16.mxu0 %vm2038_vm3, %v2037_v44  ;;  %s2041_s19 = smov 88   ;;  %s2042_s24 = smov 120   ;;  %v857_v19 = vsel %vm855_vm6, %v1638_v18, 0 }
 0x229   : > { %s2043_s27 = smov 56   ;;  %v739_v23 = vld [vmem:[%s2480_s5] sm:$0xf]  ;;  %s2510_s22 = sld [smem:[#allocation14_spill]] }
 0x22a   : > { %v903_v26 = vsel %vm855_vm6, %v739_v23, 0 }
 0x22c   : > { %v625_v42 = vld [vmem:[#allocation2 + $0x8] sm:$0xff]  ;;  %v623_v45 = vld [vmem:[%s622_s28] sm:$0xff]  ;;  %s2047_s28 = smov 72  }
 0x22d   : > { %v2240_v43 = vpack.c.bf16 %v625_v42, %v624_v41  ;;  %v626_v48 = vmul.f32 0.35355338, %v623_v45 }
 0x22f   : > { %630 = vrot.lane.b32.xlu0 %v2240_v43, %s2039_s21  ;;  %v2254_v49 = vpack.c.bf16 %v626_v48, %v626_v48  ;;  %692 = vrot.lane.b32.xlu1 %v2240_v43, %s2040_s29  ;;  %s2044_s29 = smov 80   ;;  %s2046_s21 = smov 48  }
 0x2a1   : > { %v631_v46 = vpop.permute.xlu0 %630  ;;  %v693_v55 = vpop.permute.xlu1 %692 }
 0x2a2   : > { %v637_v47 = vsel %vm632_vm4, %v631_v46, 0 }
 0x2a3   : > { %1720 = vmatpush3.bf16.xpose.msra.mxu1 %v637_v47 }
 0x2a4   : > { %1725 = vmatprep.subr.bf16.mxu1 %v2037_v44 }
 0x2aa   : > { %1722 = vmatmul.mubr.msk.bf16.vlgmr.msra.gmra.mxu1 %vm632_vm4, %v2254_v49 }
 0x2ab   : > { %1727 = vmatprep.mubr.msk.bf16.mxu1 %vm2038_vm3, %v2037_v44  ;;  %1726 = vmatpush3.bf16.msra.mxu1 %v693_v55 }
 0x2ac   : > { %1731 = vmatprep.subr.bf16.mxu1 %v2037_v44 }
 0x36a   : > { %v673_v50 = vpop.f32.mrf.mxu1 }
 0x36b   : > { %v680_v51 = vsel %vm679_vm5, %v673_v50, -inf }
 0x36c   : > { %681 = vmax.xlane.f32.xlu0 %v680_v51  ;;  %v1723_v52 = vpop.f32.mrf.mxu1 }
 0x36e   : > { %v676_v53 = vpop.f32.mrf.mxu1 }
 0x370   : > { %v1724_v54 = vpop.f32.mrf.mxu1 }
 0x3f5   : > { %v682_v56 = vpop.xlane.xlu0 %681 }
 0x3f6   : > { %v683_v57 = vsub.f32 %v673_v50, %v682_v56 }
 0x3f8   : > { %v684_v58 = vmul.f32 1.442695, %v683_v57 }
 0x3fa   : > { %1921 = vpow2.f32 %v684_v58 }
 0x407   : > { %v1922_v59 = vpop.eup %1921 }
 0x408   : > { %v686_v60 = vsel %vm679_vm5, %v1922_v59, 0.0 }
 0x409   : > { %687 = vadd.xlane.f32.xlu1 %v686_v60 }
 0x41a   : > { %743 = vrot.lane.b32.xlu1 %v2240_v43, %s2041_s19  ;;  %s2045_s19 = smov 112  }
 0x41e   : > { %741 = vrot.lane.b32.xlu1 %v2254_v49, %s2042_s24  ;;  %s1512_s24 = sshll.u32 %s475_s23, 4  ;;  %s2420_s24 = int_to_ptr.vmem [resolvable:$true] %s1512_s24 }
 0x492   : > { %v688_v61 = vpop.xlane.xlu1 %687 }
 0x493   : > { %1923 = vrcp.f32 %v688_v61 }
 0x496   : > { %v744_v63 = vpop.permute.xlu1 %743 }
 0x497   : > { %v749_v1 = vsel %vm632_vm4, %v744_v63, 0 }
 0x49a   : > { %v742_v3 = vpop.permute.xlu1 %741 }
 0x4a0   : > { %v1924_v62 = vpop.eup %1923 }
 0x4a1   : > { %v690_v0 = vmul.f32 %v1924_v62, %v1922_v59 }
 0x4a3   : > { %v691_v2 = vpack.c.bf16 %v690_v0, %v690_v0  ;;  %v1643_v0 = vld [vmem:[%s2480_s5 + $0x8] sm:$0xf] }
 0x4a5   : > { %1728 = vmatmul.mubr.msk.bf16.vlgmr.msra.gmra.mxu1 %vm679_vm5, %v691_v2 }
 0x4a6   : > { %1732 = vmatpush3.bf16.xpose.msra.mxu1 %v749_v1  ;;  %1733 = vmatprep.mubr.msk.bf16.mxu1 %vm2038_vm3, %v2037_v44  ;;  %v1060_v1 = vsel %vm855_vm6, %v1643_v0, 0  ;;  %v1914_v0 = vld [vmem:[%s2486_s11 + $0x30] sm:$0xff]  }
 0x4a7   : > { %1743 = vmatprep.subr.bf16.mxu1 %v2037_v44 }
 0x4ad   : > { %1734 = vmatmul.mubr.msk.bf16.vlgmr.msra.gmra.mxu1 %vm632_vm4, %v742_v3 }
 0x4ae   : > { %1745 = vmatprep.mubr.msk.bf16.mxu1 %vm2038_vm3, %v2037_v44  ;;  %1744 = vmatpush3.bf16.msra.mxu1 %v857_v19  ;;  %v1647_v19 = vld [vmem:[%s2480_s5 + $0xc] sm:$0xf] }
 0x4af   : > { %1755 = vmatprep.subr.bf16.mxu1 %v2037_v44 }
 0x565   : > { %v732_v4 = vpop.f32.mrf.mxu1 }
 0x566   : > { %v738_v27 = vpack.c.bf16 %v732_v4, %v732_v4 }
 0x567   : > { %v1729_v5 = vpop.f32.mrf.mxu1 }
 0x569   : > { %v735_v6 = vpop.f32.mrf.mxu1 }
 0x56b   : > { %v1730_v7 = vpop.f32.mrf.mxu1 }
 0x56d   : > { %v785_v8 = vpop.f32.mrf.mxu1 }
 0x56e   : > { %v791_v9 = vsel %vm679_vm5, %v785_v8, -inf }
 0x56f   : > { %792 = vmax.xlane.f32.xlu1 %v791_v9  ;;  %v1735_v10 = vpop.f32.mrf.mxu1 }
 0x571   : > { %v788_v11 = vpop.f32.mrf.mxu1 }
 0x573   : > { %v1736_v12 = vpop.f32.mrf.mxu1 }
 0x5f8   : > { %v793_v13 = vpop.xlane.xlu1 %792 }
 0x5f9   : > { %v794_v14 = vsub.f32 %v785_v8, %v793_v13 }
 0x5fb   : > { %v795_v15 = vmul.f32 1.442695, %v794_v14 }
 0x5fd   : > { %1925 = vpow2.f32 %v795_v15 }
 0x60a   : > { %v1926_v16 = vpop.eup %1925 }
 0x60b   : > { %v797_v17 = vsel %vm679_vm5, %v1926_v16, 0.0 }
 0x60c   : > { %798 = vadd.xlane.f32.xlu0 %v797_v17 }
 0x622   : > { %803 = vrot.lane.b32.xlu0 %v2240_v43, %s2043_s27  ;;  %s2049_s27 = smov 40  }
 0x626   : > { %947 = vrot.lane.b32.xlu0 %v2240_v43, %s2044_s29  ;;  %s2048_s29 = smov 104  }
 0x62a   : > { %945 = vrot.lane.b32.xlu0 %v2254_v49, %s2045_s19 }
 0x695   : > { %v799_v20 = vpop.xlane.xlu0 %798 }
 0x696   : > { %1927 = vrcp.f32 %v799_v20 }
 0x699   : > { %v804_v21 = vpop.permute.xlu0 %803 }
 0x69a   : > { %1738 = vmatpush3.bf16.msra.mxu0 %v804_v21  ;;  %v1218_v21 = vsel %vm855_vm6, %v1647_v19, 0 }
 0x69b   : > { %1749 = vmatprep.subr.bf16.mxu0 %v2037_v44 }
 0x69d   : > { %v948_v28 = vpop.permute.xlu0 %947 }
 0x69e   : > { %v953_v31 = vsel %vm632_vm4, %v948_v28, 0 }
 0x6a1   : > { %v946_v36 = vpop.permute.xlu0 %945 }
 0x6a3   : > { %v1928_v22 = vpop.eup %1927 }
 0x6a4   : > { %v801_v24 = vmul.f32 %v1928_v22, %v1926_v16 }
 0x6a6   : > { %v802_v25 = vpack.c.bf16 %v801_v24, %v801_v24 }
 0x6a8   : > { %1740 = vmatmul.mubr.msk.bf16.vlgmr.msra.gmra.mxu0 %vm679_vm5, %v802_v25 }
 0x6a9   : > { %1750 = vmatpush3.bf16.msra.mxu0 %v903_v26  ;;  %1751 = vmatprep.mubr.msk.bf16.mxu0 %vm2038_vm3, %v2037_v44 }
 0x6aa   : > { %1761 = vmatprep.subr.bf16.mxu0 %v2037_v44 }
 0x6b0   : > { %1752 = vmatmul.mubr.msk.bf16.vlgmr.msra.gmra.mxu0 %vm632_vm4, %v738_v27 }
 0x6b1   : > { %1763 = vmatprep.mubr.msk.bf16.mxu0 %vm2038_vm3, %v2037_v44 }
 0x768   : > { %v843_v29 = vpop.f32.mrf.mxu0 }
 0x769   : > { %v849_v30 = vpack.c.bf16 %v843_v29, %v843_v29 }
 0x76a   : > { %v1741_v32 = vpop.f32.mrf.mxu0 }
 0x76b   : > { %1746 = vmatmul.mubr.msk.bf16.vlgmr.msra.gmra.mxu1 %vm632_vm4, %v849_v30 }
 0x76c   : > { %1756 = vmatpush3.bf16.xpose.msra.mxu1 %v953_v31  ;;  %v846_v33 = vpop.f32.mrf.mxu0  ;;  %1757 = vmatprep.mubr.msk.bf16.mxu1 %vm2038_vm3, %v2037_v44 }
 0x76d   : > { %1767 = vmatprep.subr.bf16.mxu1 %v2037_v44 }
 0x76e   : > { %v1742_v34 = vpop.f32.mrf.mxu0 }
 0x770   : > { %v2301_v35 = vpop.f32.mrf.mxu0 }
 0x772   : > { %v1753_v37 = vpop.f32.mrf.mxu0 }
 0x773   : > { %1758 = vmatmul.mubr.msk.bf16.vlgmr.msra.gmra.mxu1 %vm632_vm4, %v946_v36  ;;  %v1649_v37 = vld [vmem:[%s2481_s6] ss:$0 sm:$0xff] }
 0x774   : > { %v942_v38 = vpop.f32.mrf.mxu0  ;;  %1769 = vmatprep.mubr.msk.bf16.mxu1 %vm2038_vm3, %v2037_v44  ;;  %1768 = vmatpush3.bf16.msra.mxu1 %v1060_v1  ;;  %v1915_v1 = vld [vmem:[%s2486_s11 + $0x28] sm:$0xff]  }
 0x775   : > { %1779 = vmatprep.subr.bf16.mxu1 %v2037_v44 }
 0x776   : > { %v1754_v39 = vpop.f32.mrf.mxu0 }
 0x82b   : > { %v2306_v40 = vpop.f32.mrf.mxu1 }
 0x82c   : > { %v940_v17 = vadd.f32 %v2301_v35, %v2306_v40 }
 0x82d   : > { %v1747_v41 = vpop.f32.mrf.mxu1 }
 0x82f   : > { %v896_v42 = vpop.f32.mrf.mxu1 }
 0x831   : > { %v1748_v45 = vpop.f32.mrf.mxu1 }
 0x833   : > { %v989_v46 = vpop.f32.mrf.mxu1 }
 0x834   : > { %v995_v47 = vsel %vm679_vm5, %v989_v46, -inf }
 0x835   : > { %996 = vmax.xlane.f32.xlu1 %v995_v47  ;;  %v1759_v48 = vpop.f32.mrf.mxu1 }
 0x837   : > { %v992_v50 = vpop.f32.mrf.mxu1 }
 0x839   : > { %v1760_v51 = vpop.f32.mrf.mxu1 }
 0x846   : > { %1007 = vrot.lane.b32.xlu1 %v2240_v43, %s2046_s21 }
 0x84a   : > { %1105 = vrot.lane.b32.xlu1 %v2240_v43, %s2047_s28 }
 0x84e   : > { %1103 = vrot.lane.b32.xlu1 %v2254_v49, %s2048_s29  ;;  %s620_s29 = scalar_lea.vmem %s2207_s25, %s1633_s13 }
 0x84f   : > { %v621_v34 = vld [vmem:[%s620_s29] sm:$0xff] }
 0x8be   : > { %v997_v52 = vpop.xlane.xlu1 %996 }
 0x8bf   : > { %v998_v53 = vsub.f32 %v989_v46, %v997_v52  ;;  %v1911_v52 = vld [vmem:[%s2484_s9 + $0x8] sm:$0xff]  }
 0x8c1   : > { %v999_v54 = vmul.f32 1.442695, %v998_v53  ;;  %v1912_v53 = vld [vmem:[%s2484_s9] sm:$0xff]  }
 0x8c2   : > { %v1008_v57 = vpop.permute.xlu1 %1007 }
 0x8c3   : > { %1929 = vpow2.f32 %v999_v54  ;;  %1762 = vmatpush3.bf16.msra.mxu0 %v1008_v57 }
 0x8c4   : > { %1773 = vmatprep.subr.bf16.mxu0 %v2037_v44 }
 0x8c6   : > { %v1106_v60 = vpop.permute.xlu1 %1105 }
 0x8c7   : > { %v1111_v62 = vsel %vm632_vm4, %v1106_v60, 0  ;;  %v1651_v60 = vld [vmem:[%s2483_s8] ss:$0 sm:$0xff] }
 0x8ca   : > { %v1104_v63 = vpop.permute.xlu1 %1103 }
 0x8d0   : > { %v1930_v55 = vpop.eup %1929 }
 0x8d1   : > { %v1001_v56 = vsel %vm679_vm5, %v1930_v55, 0.0 }
 0x8d2   : > { %1002 = vadd.xlane.f32.xlu0 %v1001_v56 }
 0x95b   : > { %v1003_v58 = vpop.xlane.xlu0 %1002 }
 0x95c   : > { %1931 = vrcp.f32 %v1003_v58  ;;  %v1650_v58 = vld [vmem:[%s2482_s7] ss:$0 sm:$0xff] }
 0x969   : > { %v1932_v59 = vpop.eup %1931 }
 0x96a   : > { %v1005_v61 = vmul.f32 %v1932_v59, %v1930_v55 }
 0x96c   : > { %v1006_v49 = vpack.c.bf16 %v1005_v61, %v1005_v61 }
 0x96e   : > { %1764 = vmatmul.mubr.msk.bf16.vlgmr.msra.gmra.mxu0 %vm679_vm5, %v1006_v49 }
 0x96f   : > { %1774 = vmatpush3.bf16.xpose.msra.mxu0 %v1111_v62  ;;  %1775 = vmatprep.mubr.msk.bf16.mxu0 %vm2038_vm3, %v2037_v44 }
 0x970   : > { %1785 = vmatprep.subr.bf16.mxu0 %v2037_v44 }
 0x976   : > { %1776 = vmatmul.mubr.msk.bf16.vlgmr.msra.gmra.mxu0 %vm632_vm4, %v1104_v63  ;;  %v1913_v63 = vld [vmem:[%s2486_s11 + $0x38] sm:$0xff]  }
 0x977   : > { %1787 = vmatprep.mubr.msk.bf16.mxu0 %vm2038_vm3, %v2037_v44  ;;  %1786 = vmatpush3.bf16.msra.mxu0 %v1218_v21 }
 0x978   : > { %1799 = vmatprep.subr.bf16.mxu0 %v2037_v44 }
 0xa2e   : > { %v1047_v2 = vpop.f32.mrf.mxu0 }
 0xa2f   : > { %v1053_v3 = vpack.c.bf16 %v1047_v2, %v1047_v2  ;;  %v1916_v2 = vld [vmem:[%s2486_s11 + $0x20] sm:$0xff]  }
 0xa30   : > { %v1765_v4 = vpop.f32.mrf.mxu0 }
 0xa31   : > { %1770 = vmatmul.mubr.msk.bf16.vlgmr.msra.gmra.mxu1 %vm632_vm4, %v1053_v3  ;;  %v1917_v3 = vld [vmem:[%s2486_s11 + $0x18] sm:$0xff]   ;;  %v1918_v4 = vld [vmem:[%s2486_s11 + $0x10] sm:$0xff]  }
 0xa32   : > { %v1050_v5 = vpop.f32.mrf.mxu0  ;;  %1781 = vmatprep.mubr.msk.bf16.mxu1 %vm2038_vm3, %v2037_v44 }
 0xa33   : > { %v1919_v5 = vld [vmem:[%s2486_s11 + $0x8] sm:$0xff]  }
 0xa34   : > { %v1766_v6 = vpop.f32.mrf.mxu0 }
 0xa35   : > { %v1920_v6 = vld [vmem:[%s2486_s11] sm:$0xff]  }
 0xa36   : > { %v1147_v7 = vpop.f32.mrf.mxu0 }
 0xa37   : > { %v1153_v8 = vsel %vm679_vm5, %v1147_v7, -inf }
 0xa38   : > { %1154 = vmax.xlane.f32.xlu1 %v1153_v8  ;;  %v1777_v9 = vpop.f32.mrf.mxu0 }
 0xa3a   : > { %v1150_v10 = vpop.f32.mrf.mxu0 }
 0xa3c   : > { %v1778_v11 = vpop.f32.mrf.mxu0 }
 0xac1   : > { %v1155_v12 = vpop.xlane.xlu1 %1154 }
 0xac2   : > { %v1156_v13 = vsub.f32 %v1147_v7, %v1155_v12  ;;  %v1652_v7 = vld [vmem:[%s2485_s10] ss:$0 sm:$0xff] }
 0xac4   : > { %v1157_v14 = vmul.f32 1.442695, %v1156_v13 }
 0xac6   : > { %1933 = vpow2.f32 %v1157_v14 }
 0xad3   : > { %v1934_v15 = vpop.eup %1933 }
 0xad4   : > { %v1159_v16 = vsel %vm679_vm5, %v1934_v15, 0.0 }
 0xad5   : > { %1160 = vadd.xlane.f32.xlu0 %v1159_v16 }
 0xaeb   : > { %1165 = vrot.lane.b32.xlu0 %v2240_v43, %s2049_s27  ;;  %s1666_s27 = sshll.u32 %s2021_s17, 1 }
 0xaec   : > { %s1508_s21 = sadd.s32 %s2017_s16, %s1666_s27  ;;  %s2511_s16 = sand.u32 1, %s2009_s30  }
 0xaed   : > { %s1667_s19 = sshll.u32 %s1508_s21, 7  ;;  %s1492_s17 = scalar_lea.sflag [#allocation4], %s2511_s16 }
 0xaee   : > { %s2418_s0 = scalar_lea.hbm %s2510_s22, %s1667_s19  ;;  %s1941_s27 = scalar_lea.vmem %s2420_s24, 128 }
 0xaef   : > { %p1942_p0 = scmp.ne.s32.totalorder %s2420_s24, %s1941_s27  ;;  %s2050_s21 = smov [#allocation3]  }
 0xaf0   : > { %s1945_s28 = sshll.u32 %s2050_s21, 4  ;;  %s1946_s28 = int_to_ptr.vmem [resolvable:$false] %s1945_s28 }
 0xaf1   : > { %v1096_v18 = vpop.f32.mrf.mxu1  ;;  %p1943_p1 = pnand %p1942_p0, %p2177_p3  ;;  %s1947_s29 = scalar_lea.vmem %s1946_s28, 256 }
 0xaf2   : > { %v1102_v20 = vadd.f32 %v1096_v18, %v940_v17  ;;  %p1948_p4 = scmp.lt.s32.totalorder %s2420_s24, %s1946_s28  ;;  %p1949_p5 = scmp.lt.s32.totalorder %s1947_s29, %s1941_s27 }
 0xaf3   : > { %v1771_v22 = vpop.f32.mrf.mxu1  ;;  %p1944_p2 = pneg %p1943_p1 }
 0xaf4   : > { %v1656_v22 = vld [vmem:[%s2487_s12] ss:$0 sm:$0xff]  ;;  %p1950_p6 = por %p1949_p5, %p1948_p4 }
 0xaf5   : > { %v1099_v23 = vpop.f32.mrf.mxu1 }
 0xaf6   : > { %p1951_p7 = pnand %p1950_p6, %p1944_p2 }
 0xaf7   : > { %v1772_v24 = vpop.f32.mrf.mxu1 }
 0xb5e   : > { %v1161_v25 = vpop.xlane.xlu0 %1160 }
 0xb5f   : > { %1935 = vrcp.f32 %v1161_v25 }
 0xb62   : > { %v1166_v43 = vpop.permute.xlu0 %1165 }
 0xb63   : > { %1780 = vmatpush3.bf16.msra.mxu1 %v1166_v43 }
 0xb64   : > { %1791 = vmatprep.subr.bf16.mxu1 %v2037_v44 }
 0xb6c   : > { %v1936_v26 = vpop.eup %1935 }
 0xb6d   : > { %v1163_v27 = vmul.f32 %v1936_v26, %v1934_v15 }
 0xb6f   : > { %v1164_v28 = vpack.c.bf16 %v1163_v27, %v1163_v27 }
 0xb71   : > { %1782 = vmatmul.mubr.msk.bf16.vlgmr.msra.gmra.mxu1 %vm679_vm5, %v1164_v28 }
 0xb72   : > { %1795 = vmatprep.mubr.msk.bf16.mxu1 %vm2038_vm3, %v2037_v44  ;;  %1792 = vmatpush3.bf16.msra.mxu1 %v1911_v52 }
 0xb73   : > { %1793 = vmatprep.subr.bf16.mxu1 %v2037_v44 }
 0xb76   : > { %1794 = vmatpush3.bf16.msra.mxu1 %v1912_v53 }
 0xc31   : > { %v1205_v29 = vpop.f32.mrf.mxu1 }
 0xc32   : > { %v1211_v30 = vpack.c.bf16 %v1205_v29, %v1205_v29 }
 0xc33   : > { %v1783_v31 = vpop.f32.mrf.mxu1 }
 0xc34   : > { %1788 = vmatmul.mubr.msk.bf16.vlgmr.msra.gmra.mxu0 %vm632_vm4, %v1211_v30 }
 0xc35   : > { %v1208_v32 = vpop.f32.mrf.mxu1  ;;  %1815 = vmatprep.mubr.msk.bf16.mxu0 %vm2038_vm3, %v2037_v44  ;;  %1800 = vmatpush3.bf16.msra.mxu0 %v1913_v63 }
 0xc36   : > { %1801 = vmatprep.subr.bf16.mxu0 %v2037_v44 }
 0xc37   : > { %v1784_v33 = vpop.f32.mrf.mxu1 }
 0xc39   : > { %1802 = vmatpush3.bf16.msra.mxu0 %v1914_v0 }
 0xc3a   : > { %1803 = vmatprep.subr.bf16.mxu0 %v2037_v44 }
 0xc3d   : > { %1804 = vmatpush3.bf16.msra.mxu0 %v1915_v1 }
 0xc3e   : > { %1805 = vmatprep.subr.bf16.mxu0 %v2037_v44 }
 0xc41   : > { %1806 = vmatpush3.bf16.msra.mxu0 %v1916_v2 }
 0xc42   : > { %1807 = vmatprep.subr.bf16.mxu0 %v2037_v44 }
 0xc45   : > { %1808 = vmatpush3.bf16.msra.mxu0 %v1917_v3 }
 0xc46   : > { %1809 = vmatprep.subr.bf16.mxu0 %v2037_v44 }
 0xc49   : > { %1810 = vmatpush3.bf16.msra.mxu0 %v1918_v4 }
 0xc4a   : > { %1811 = vmatprep.subr.bf16.mxu0 %v2037_v44 }
 0xc4d   : > { %1812 = vmatpush3.bf16.msra.mxu0 %v1919_v5 }
 0xc4e   : > { %1813 = vmatprep.subr.bf16.mxu0 %v2037_v44 }
 0xc51   : > { %1814 = vmatpush3.bf16.msra.mxu0 %v1920_v6 }
 0xcf4   : > { %v1254_v35 = vpop.f32.mrf.mxu0 }
 0xcf5   : > { %v1260_v36 = vadd.f32 %v1254_v35, %v1102_v20 }
 0xcf6   : > { %v1789_v38 = vpop.f32.mrf.mxu0 }
 0xcf7   : > { %v1261_v39 = vadd.f32 %v1260_v36, %v621_v34 }
 0xcf8   : > { %v1257_v40 = vpop.f32.mrf.mxu0 }
 0xcf9   : > { %v2353_v41 = vadd.f32 %v1649_v37, %v1261_v39 }
 0xcfa   : > { %v1790_v42 = vpop.f32.mrf.mxu0 }
 0xcfb   : > { %v1273_v45 = vsel %vm1272_vm7, %v2353_v41, 0.0 }
 0xcfc   : > { %1274 = vadd.xlane.f32.xlu0 %v1273_v45 }
 0xd85   : > { %v1275_v46 = vpop.xlane.xlu0 %1274 }
 0xd86   : > { %v1277_v47 = vmul.f32 0.03125, %v1275_v46 }
 0xd88   : > { %v1278_v48 = vsub.f32 %v2353_v41, %v1277_v47 }
 0xd8a   : > { %v1279_v50 = vmul.f32 %v1278_v48, %v1278_v48 }
 0xd8c   : > { %v1280_v51 = vsel %vm1272_vm7, %v1279_v50, 0.0 }
 0xd8d   : > { %1281 = vadd.xlane.f32.xlu1 %v1280_v51 }
 0xe16   : > { %v1282_v54 = vpop.xlane.xlu1 %1281 }
 0xe17   : > { %v1283_v55 = vmul.f32 0.03125, %v1282_v54 }
 0xe19   : > { %v1284_v56 = vadd.f32 1e-06, %v1283_v55 }
 0xe1b   : > { %1937 = vrsqrt.f32 %v1284_v56 }
 0xe28   : > { %v1938_v57 = vpop.eup %1937 }
 0xe29   : > { %v1286_v59 = vmul.f32 %v1938_v57, %v1278_v48 }
 0xe2b   : > { %v1293_v61 = vmul.f32 %v1650_v58, %v1286_v59 }
 0xe2d   : > { %v1300_v62 = vadd.f32 %v1651_v60, %v1293_v61 }
 0xe2f   : > { %v1301_v49 = vpack.c.bf16 %v1300_v62, %v1300_v62 }
 0xe31   : > { %1796 = vmatmul.mubr.msk.bf16.vlgmr.msra.gmra.mxu1 %vm1272_vm7, %v1301_v49 }
 0xef1   : > { %v1362_v8 = vpop.f32.mrf.mxu1 }
 0xef2   : > { %v1363_v9 = vadd.f32 %v1652_v7, %v1362_v8 }
 0xef3   : > { %v1797_v10 = vpop.f32.mrf.mxu1 }
 0xef4   : > { %v1368_v11 = vmul.f32 %v1363_v9, %v1363_v9 }
 0xef5   : > { %v1365_v12 = vpop.f32.mrf.mxu1 }
 0xef6   : > { %v1369_v13 = vmul.f32 %v1368_v11, %v1363_v9 }
 0xef7   : > { %v1798_v14 = vpop.f32.mrf.mxu1 }
 0xef8   : > { %v1370_v15 = vmul.f32 0.044715, %v1369_v13 }
 0xefa   : > { %v1371_v16 = vadd.f32 %v1370_v15, %v1363_v9 }
 0xefc   : > { %v1372_v17 = vmul.f32 0.7978846, %v1371_v16 }
 0xefe   : > { %1939 = vtanh.f32 %v1372_v17 }
 0xf0b   : > { %v1940_v44 = vpop.eup %1939 }
 0xf0c   : > { %v1374_v18 = vadd.f32 1.0, %v1940_v44 }
 0xf0e   : > { %v1375_v19 = vmul.f32 0.5, %v1374_v18 }
 0xf10   : > { %v1376_v20 = vmul.f32 %v1375_v19, %v1363_v9 }
 0xf12   : > { %v1377_v21 = vpack.c.bf16 %v1376_v20, %v1376_v20 }
 0xf14   : > { %1816 = vmatmul.mubr.bf16.vlgmr.msra.gmra.mxu0 %v1377_v21 }
 0xfd4   : > { %v1483_v23 = vpop.f32.mrf.mxu0 }
 0xfd5   : > { %v1484_v24 = vadd.f32 %v1656_v22, %v1483_v23 }
 0xfd6   : > { %v1817_v25 = vpop.f32.mrf.mxu0 }
 0xfd7   : > { %v1489_v43 = vadd.f32 %v1484_v24, %v2353_v41 }
 0xfd8   : > { %v1486_v26 = vpop.f32.mrf.mxu0 }
 0xfd9   : > { %1490 = vst.msk [vmem:[%s475_s23] sm:$0xff] %vm1272_vm7, %v1489_v43 }
 0xfda   : > { %v1818_v27 = vpop.f32.mrf.mxu0 }
 0xfdb   : > { %1954 = shalt.err (!%p1951_p7)
}
 0xfdc   : > { %s1955_s18 = scalar_lea.hbm %s2418_s0, 128  ;;  %s1959_s25 = scalar_lea.hbm %s2510_s22, 512 }
 0xfdd   : > { %p1956_p9 = scmp.ne.s32.totalorder %s2418_s0, %s1955_s18  ;;  %p1960_p12 = scmp.lt.s32.totalorder %s2418_s0, %s2510_s22 }
 0xfde   : > { %p1961_p13 = scmp.lt.s32.totalorder %s1959_s25, %s1955_s18 }
 0xfdf   : > { %p1957_p10 = pnand %p1956_p9, %p2177_p3 }
 0xfe0   : > { %p1962_p0 = por %p1961_p13, %p1960_p12 }
 0xfe1   : > { %p1958_p11 = pneg %p1957_p10 }
 0xfe3   : > { %p1963_p1 = pnand %p1962_p0, %p1958_p11 }
 0xfe5   : > { %1966 = shalt.err (!%p1963_p1)
}
 0xfe6   : > { %1819 = dma.vmem_to_hbm [thread:$0]  (%p2177_p3), %s2420_s24, 128, %s2418_s0, %s1492_s17  }
 0xfe7 PF: > { %s2512_s27 = sld [smem:[#allocation6_spill]]  ;;  %p1825_p2 = scmp.ge.s32.totalorder %s2033_s20, 2 }
 0xfe9   : > { %p1822_p4 = pnand %p1825_p2, %p2186_p8 }
 0xfeb   : > { %p1823_p5 = pneg %p1822_p4 }
 0xfed   : > { %s1527_s28 = sand.u32 1, %s2512_s27  }
 0xfee   : > { %s1528_s29 = scalar_lea.sflag [#allocation4], %s1527_s28 }
 0xfef   : > { %2000 = dma.done.wait (%p1823_p5), %s1528_s29, 128  }
 0xff0   : > { %2002 = vsyncadd (%p1823_p5), %s1528_s29, 4294967168  ;;  %s28_s20 = sadd.s32 1, %s2033_s20   ;;  %s2514_s26 = sld [smem:[#allocation12_spill]] }
 0xff1   : > { %p25_p6 = scmp.ge.s32.totalorder %s28_s20, 6   ;;  %s2515_s16 = sld [smem:[#allocation7_spill]] }
 0xff2   : > { %s2516_s17 = sld [smem:[#allocation8_spill]]  ;;  %s2519_s29 = smov %s2009_s30 }
 0xff3   : > { %s2517_s18 = sld [smem:[#allocation9_spill]]  ;;  %s2520_s30 = smov %s2013_s15 }
 0xff4   : > { %s2518_s19 = sld [smem:[#allocation10_spill]]  ;;  %27 = sbr.rel (!%p25_p6) target bundleno = 8 (0x8), region = 128 }
 0xff6   : > { %s2521_s15 = smov %s2514_s26 }
 0xff9   :  { %1541 = vsyncpa [#allocation4], 1 }
 0xffa   :  { %1543 = vsyncpa [#allocation4 + $0x1], 1 }

// kernel: transformer_block.1
= control target key start
LH: loop header
LB: loop body
LE: loop exit
PB: predicated region body
PF: predicated region fallthrough
CT: control target
= control target key end

     0   :  { %s2475_s0 = inlined_call_operand.vmem [shape: f32[2,16,32], index: 0, kind: input, shape index: {}]   ;;  %s2476_s1 = inlined_call_operand.vmem [shape: f32[1,32], index: 1, kind: input, shape index: {}]   ;;  %s2477_s2 = inlined_call_operand.vmem [shape: f32[1,32], index: 2, kind: input, shape index: {}]   ;;  %s2478_s3 = inlined_call_operand.vmem [shape: bf16[32,96], index: 3, kind: input, shape index: {}]   ;;  %s2479_s4 = inlined_call_operand.vmem [shape: f32[1,96], index: 4, kind: input, shape index: {}]   ;;  %s2480_s5 = inlined_call_operand.vmem [shape: bf16[4,8,32], index: 5, kind: input, shape index: {}]   ;;  %s2481_s6 = inlined_call_operand.vmem [shape: f32[1,32], index: 6, kind: input, shape index: {}]   ;;  %s2482_s7 = inlined_call_operand.vmem [shape: f32[1,32], index: 7, kind: input, shape index: {}]   ;;  %s2483_s8 = inlined_call_operand.vmem [shape: f32[1,32], index: 8, kind: input, shape index: {}]   ;;  %s2484_s9 = inlined_call_operand.vmem [shape: bf16[32,128], index: 9, kind: input, shape index: {}]   ;;  %s2485_s10 = inlined_call_operand.vmem [shape: f32[1,128], index: 10, kind: input, shape index: {}]   ;;  %s2486_s11 = inlined_call_operand.vmem [shape: bf16[128,32], index: 11, kind: input, shape index: {}]   ;;  %s2487_s12 = inlined_call_operand.vmem [shape: f32[1,32], index: 12, kind: input, shape index: {}]   ;;  %s2488_s13 = inlined_call_operand.hbm [shape: f32[2,16,32], index: 13, kind: output, shape index: {0}]   ;;  %s2489_s14 = inlined_call_operand.vmem [shape: f32[2,16,96], index: 14, kind: output, shape index: {1}]  }
   0x1   :  { %2498 = sst [smem:[#allocation13_spill]] %s2475_s0 }
   0x2   :  { %2499 = sst [smem:[#allocation14_spill]] %s2488_s13 }
   0x3   :  { %20 = vsyncpa [#allocation4], 0 }
   0x4   :  { %22 = vsyncpa [#allocation4 + $0x1], 0  ;;  %s2126_s29 = smov 0   ;;  %s2128_s30 = smov 0  }
   0x5   :  { %s2130_s15 = smov 0   ;;  %s2132_s16 = smov 0  }
   0x6   :  { %s2134_s17 = smov 0   ;;  %s2136_s18 = smov 0  }
   0x7   :  { %s2138_s19 = smov 0   ;;  %s2140_s20 = smov 0  }
   0x8 LB: > { %2500 = sst [smem:[#allocation6_spill]] %s2005_s29  ;;  %s1616_s21 = sadd.s32 4294967295, %s2033_s20   ;;  %s2033_s20 = sphi %s2140_s20, %s28_s20   ;;  %s2029_s19 = sphi %s2138_s19, %s2518_s19   ;;  %s2025_s18 = sphi %s2136_s18, %s2517_s18   ;;  %s2021_s17 = sphi %s2134_s17, %s2516_s17   ;;  %s2017_s16 = sphi %s2132_s16, %s2515_s16   ;;  %s2013_s15 = sphi %s2130_s15, %s2521_s15   ;;  %s2009_s30 = sphi %s2128_s30, %s2520_s30   ;;  %s2005_s29 = sphi %s2126_s29, %s2519_s29  }
   0x9   : > { %2501 = sst [smem:[#allocation7_spill]] %s2025_s18  ;;  %s1617_s22 = sadd.s32 4294967294, %s2033_s20  }
   0xa   : > { %2502 = sst [smem:[#allocation8_spill]] %s2029_s19  ;;  %s37_s23 = sadd.s32 1, %s2025_s18 }
   0xb   : > { %p38_p0 = scmp.ge.s32.totalorder %s37_s23, 2  ;;  %s40_s24 = sadd.s32 1, %s2029_s19 }
   0xc   : > { %p337_p1 = scmp.ne.s32.totalorder %s2013_s15, %s2009_s30  ;;  %p338_p2 = scmp.eq.s32.totalorder %s1616_s21, 3 }
   0xd   : > { %s2523_s23 = smov (%p38_p0, %s37_s23), 0  ;;  %s2525_s24 = smov (!%p38_p0, %s40_s24), %s2029_s19 }
   0xe   : > { %2503 = sst [smem:[#allocation9_spill]] %s2523_s23  ;;  %s323_s25 = ssub.s32 %s2025_s18, %s2523_s23 }
   0xf   : > { %p2177_p3 = por %p338_p2, %p337_p1  ;;  %p42_p4 = scmp.ge.s32.totalorder %s2525_s24, 2 }
  0x10   : > { %p343_p5 = scmp.ne.s32.totalorder %s2009_s30, %s2005_s29  ;;  %p344_p6 = scmp.eq.s32.totalorder %s1617_s22, 3 }
  0x11   : > { %p1620_p7 = scmp.ge.s32.totalorder %s2033_s20, 1  ;;  %s2527_s24 = smov (%p42_p4, %s2525_s24), 0 }
  0x12   : > { %2505 = sst [smem:[#allocation10_spill]] %s2527_s24  ;;  %p2186_p8 = por %p344_p6, %p343_p5 }
  0x13   : > { %p432_p9 = scmp.lt.s32.totalorder %s2033_s20, 5  ;;  %s322_s28 = ssub.s32 %s2029_s19, %s2527_s24 }
  0x14   : > { %s2506_s27 = scalar_select %p2186_p8, 1, 0 }
  0x15   : > { %s327_s21 = sadd.s32 1, %s2013_s15  ;;  %s324_s13 = sor.u32 %s323_s25, %s322_s28 }
  0x16   : > { %2507 = sst [smem:[#allocation11_spill]] %s2506_s27  ;;  %p433_p10 = pnand %p1620_p7, %p432_p9 }
  0x17   : > { %p325_p11 = scmp.eq.s32.totalorder %s324_s13, 0  ;;  %s2497_s22 = sand.u32 (!%p433_p10), 1, %s2009_s30  }
  0x18   : > { %436 = sbr.rel (%p433_p10) target bundleno = 4071 (0xfe7), region = 72  ;;  %p483_p12 = scmp.lt.s32.totalorder (!%p433_p10), %s2021_s17, 1 }
  0x19   : > { %s2195_s23 = scalar_select %p325_p11, %s2013_s15, %s327_s21  }
  0x1a   : > { %s2201_s18 = sshll.u32 (!%p433_p10), %s2497_s22, 3  ;;  %s2509_s0 = sld [smem:[#allocation13_spill]] (!%p433_p10) }
  0x1b   : > { %2508 = sst [smem:[#allocation12_spill]] %s2195_s23  ;;  %s475_s23 = scalar_lea.vmem (!%p433_p10), [#allocation3], %s2201_s18 }
  0x1c   : > { %p1626_p13 = scmp.ne.s32.totalorder (!%p433_p10), %s2017_s16, 0 }
  0x1d   : > { %s484_s27 = scalar_select %p483_p12, %s2021_s17, 1 }
  0x1e   : > { %497 = sbr.rel (%p1626_p13) target bundleno = 550 (0x226), region = 76 }
  0x1f   : > { %s1670_s29 = sshll.u32 %s484_s27, 4 }
  0x20   : > { %s2207_s25 = scalar_lea.vmem %s2509_s0, %s1670_s29  ;;  %s2212_s21 = scalar_lea.vmem %s2489_s14, %s1670_s29 }
  0x23   : > { %v498_v0 = vld [vmem:[%s2207_s25] sm:$0xff]  ;;  %vm502_vm0 = vcmask 261120   ;;  %v499_v1 = vld [vmem:[%s2207_s25 + $0x8] sm:$0xff]  ;;  %v2035_v15 = vmov 0.0   ;;  %vm2036_vm1 = vmmov 0   ;;  %vm614_vm2 = vcmask 785408  }
  0x24   : > { %v503_v2 = vsel %vm502_vm0, %v498_v0, 0.0  ;;  %v506_v3 = vsel %vm502_vm0, %v499_v1, 0.0  ;;  %v1905_v14 = vld [vmem:[%s2478_s3 + $0x8] sm:$0xff]   ;;  %1711 = vmatprep.subr.bf16.mxu0 %v2035_v15  ;;  %1715 = vmatprep.mubr.msk.bf16.mxu0 %vm2036_vm1, %v2035_v15  ;;  %v1906_v16 = vld [vmem:[%s2478_s3] sm:$0xff]  }
  0x25   : > { %504 = vadd.xlane.f32.xlu0 %v503_v2  ;;  %1712 = vmatpush3.bf16.msra.mxu0 %v1905_v14  ;;  %v1627_v25 = vld [vmem:[%s2476_s1] ss:$0 sm:$0xff] }
  0x26   : > { %1713 = vmatprep.subr.bf16.mxu0 %v2035_v15  ;;  %v1628_v29 = vld [vmem:[%s2477_s2] ss:$0 sm:$0xff] }
  0x27   : > { %v1629_v34 = vld [vmem:[%s2479_s4] ss:$0 sm:$0xff] }
  0x29   : > { %507 = vadd.xlane.f32.xlu0 %v506_v3  ;;  %1714 = vmatpush3.bf16.msra.mxu0 %v1906_v16 }
  0xae   : > { %v505_v4 = vpop.xlane.xlu0 %504 }
  0xaf   : > { %v510_v5 = vmul.f32 0.03125, %v505_v4 }
  0xb1   : > { %v512_v6 = vsub.f32 %v498_v0, %v510_v5 }
  0xb2   : > { %v508_v7 = vpop.xlane.xlu0 %507 }
  0xb3   : > { %v511_v8 = vmul.f32 0.03125, %v508_v7  ;;  %v514_v9 = vmul.f32 %v512_v6, %v512_v6 }
  0xb5   : > { %v513_v10 = vsub.f32 %v499_v1, %v511_v8  ;;  %v516_v11 = vsel %vm502_vm0, %v514_v9, 0.0 }
  0xb6   : > { %517 = vadd.xlane.f32.xlu1 %v516_v11 }
  0xb7   : > { %v515_v12 = vmul.f32 %v513_v10, %v513_v10 }
  0xb9   : > { %v519_v13 = vsel %vm502_vm0, %v515_v12, 0.0 }
  0xba   : > { %520 = vadd.xlane.f32.xlu1 %v519_v13 }
 0x13f   : > { %v518_v17 = vpop.xlane.xlu1 %517 }
 0x140   : > { %v522_v18 = vmul.f32 0.03125, %v518_v17 }
 0x142   : > { %v524_v19 = vadd.f32 1e-06, %v522_v18 }
 0x143   : > { %v521_v20 = vpop.xlane.xlu1 %520 }
 0x144   : > { %1907 = vrsqrt.f32 %v524_v19  ;;  %v523_v21 = vmul.f32 0.03125, %v521_v20 }
 0x146   : > { %v525_v22 = vadd.f32 1e-06, %v523_v21 }
 0x148   : > { %1909 = vrsqrt.f32 %v525_v22 }
 0x151   : > { %v1908_v23 = vpop.eup %1907 }
 0x152   : > { %v528_v24 = vmul.f32 %v1908_v23, %v512_v6 }
 0x154   : > { %v536_v28 = vmul.f32 %v1627_v25, %v528_v24 }
 0x155   : > { %v1910_v26 = vpop.eup %1909 }
 0x156   : > { %v529_v27 = vmul.f32 %v1910_v26, %v513_v10  ;;  %v544_v31 = vadd.f32 %v1628_v29, %v536_v28 }
 0x158   : > { %v537_v30 = vmul.f32 %v1627_v25, %v529_v27 }
 0x15a   : > { %v545_v32 = vadd.f32 %v1628_v29, %v537_v30 }
 0x15c   : > { %v546_v33 = vpack.c.bf16 %v545_v32, %v544_v31 }
 0x15e   : > { %1716 = vmatmul.mubr.msk.bf16.vlgmr.msra.gmra.mxu0 %vm502_vm0, %v546_v33 }
 0x21e   : > { %v607_v35 = vpop.f32.mrf.mxu0 }
 0x21f   : > { %v608_v36 = vadd.f32 %v1629_v34, %v607_v35 }
 0x220   : > { %v1717_v37 = vpop.f32.mrf.mxu0 }
 0x221   : > { %615 = vst.msk [vmem:[#allocation2] sm:$0xff] %vm614_vm2, %v608_v36  ;;  %617 = vst.msk [vmem:[%s2212_s21] sm:$0xff] %vm614_vm2, %v608_v36 }
 0x222   : > { %v610_v38 = vpop.f32.mrf.mxu0 }
 0x223   : > { %v611_v39 = vadd.f32 %v1629_v34, %v610_v38 }
 0x224   : > { %v1718_v40 = vpop.f32.mrf.mxu0 }
 0x225   : > { %616 = vst.msk [vmem:[#allocation2 + $0x8] sm:$0xff] %vm614_vm2, %v611_v39  ;;  %618 = vst.msk [vmem:[%s2212_s21 + $0x8] sm:$0xff] %vm614_vm2, %v611_v39 }
 0x226 PF: > { %v2037_v44 = vmov 0.0   ;;  %vm2038_vm3 = vmmov 0   ;;  %s2039_s21 = smov 96   ;;  %s1633_s13 = sshll.u32 %s2017_s16, 3  ;;  %vm632_vm4 = vcmask 64512   ;;  %vm679_vm5 = vcmask 130048  }
 0x227   : > { %1719 = vmatprep.subr.bf16.mxu1 %v2037_v44  ;;  %1721 = vmatprep.mubr.msk.bf16.mxu1 %vm2038_vm3, %v2037_v44  ;;  %s622_s28 = scalar_lea.vmem [#allocation2], %s1633_s13  ;;  %s2040_s29 = smov 64   ;;  %vm855_vm6 = vcmask 1043456   ;;  %v1638_v18 = vld [vmem:[%s2480_s5 + $0x4] sm:$0xf]  ;;  %vm1272_vm7 = vcmask 261120  }
 0x228   : > { %v624_v41 = vld [vmem:[#allocation2] sm:$0xff]  ;;  %1737 = vmatprep.subr.bf16.mxu0 %v2037_v44  ;;  %1739 = vmatprep.mubr.msk.bf16.mxu0 %vm2038_vm3, %v2037_v44  ;;  %s2041_s19 = smov 88   ;;  %s2042_s24 = smov 120   ;;  %v857_v19 = vsel %vm855_vm6, %v1638_v18, 0 }
 0x229   : > { %s2043_s27 = smov 56   ;;  %v739_v23 = vld [vmem:[%s2480_s5] sm:$0xf]  ;;  %s2510_s22 = sld [smem:[#allocation14_spill]] }
 0x22a   : > { %v903_v26 = vsel %vm855_vm6, %v739_v23, 0 }
 0x22c   : > { %v625_v42 = vld [vmem:[#allocation2 + $0x8] sm:$0xff]  ;;  %v623_v45 = vld [vmem:[%s622_s28] sm:$0xff]  ;;  %s2047_s28 = smov 72  }
 0x22d   : > { %v2240_v43 = vpack.c.bf16 %v625_v42, %v624_v41  ;;  %v626_v48 = vmul.f32 0.35355338, %v623_v45 }
 0x22f   : > { %630 = vrot.lane.b32.xlu0 %v2240_v43, %s2039_s21  ;;  %v2254_v49 = vpack.c.bf16 %v626_v48, %v626_v48  ;;  %692 = vrot.lane.b32.xlu1 %v2240_v43, %s2040_s29  ;;  %s2044_s29 = smov 80   ;;  %s2046_s21 = smov 48  }
 0x2a1   : > { %v631_v46 = vpop.permute.xlu0 %630  ;;  %v693_v55 = vpop.permute.xlu1 %692 }
 0x2a2   : > { %v637_v47 = vsel %vm632_vm4, %v631_v46, 0 }
 0x2a3   : > { %1720 = vmatpush3.bf16.xpose.msra.mxu1 %v637_v47 }
 0x2a4   : > { %1725 = vmatprep.subr.bf16.mxu1 %v2037_v44 }
 0x2aa   : > { %1722 = vmatmul.mubr.msk.bf16.vlgmr.msra.gmra.mxu1 %vm632_vm4, %v2254_v49 }
 0x2ab   : > { %1727 = vmatprep.mubr.msk.bf16.mxu1 %vm2038_vm3, %v2037_v44  ;;  %1726 = vmatpush3.bf16.msra.mxu1 %v693_v55 }
 0x2ac   : > { %1731 = vmatprep.subr.bf16.mxu1 %v2037_v44 }
 0x36a   : > { %v673_v50 = vpop.f32.mrf.mxu1 }
 0x36b   : > { %v680_v51 = vsel %vm679_vm5, %v673_v50, -inf }
 0x36c   : > { %681 = vmax.xlane.f32.xlu0 %v680_v51  ;;  %v1723_v52 = vpop.f32.mrf.mxu1 }
 0x36e   : > { %v676_v53 = vpop.f32.mrf.mxu1 }
 0x370   : > { %v1724_v54 = vpop.f32.mrf.mxu1 }
 0x3f5   : > { %v682_v56 = vpop.xlane.xlu0 %681 }
 0x3f6   : > { %v683_v57 = vsub.f32 %v673_v50, %v682_v56 }
 0x3f8   : > { %v684_v58 = vmul.f32 1.442695, %v683_v57 }
 0x3fa   : > { %1921 = vpow2.f32 %v684_v58 }
 0x407   : > { %v1922_v59 = vpop.eup %1921 }
 0x408   : > { %v686_v60 = vsel %vm679_vm5, %v1922_v59, 0.0 }
 0x409   : > { %687 = vadd.xlane.f32.xlu1 %v686_v60 }
 0x41a   : > { %743 = vrot.lane.b32.xlu1 %v2240_v43, %s2041_s19  ;;  %s2045_s19 = smov 112  }
 0x41e   : > { %741 = vrot.lane.b32.xlu1 %v2254_v49, %s2042_s24  ;;  %s1512_s24 = sshll.u32 %s475_s23, 4  ;;  %s2420_s24 = int_to_ptr.vmem [resolvable:$true] %s1512_s24 }
 0x492   : > { %v688_v61 = vpop.xlane.xlu1 %687 }
 0x493   : > { %1923 = vrcp.f32 %v688_v61 }
 0x496   : > { %v744_v63 = vpop.permute.xlu1 %743 }
 0x497   : > { %v749_v1 = vsel %vm632_vm4, %v744_v63, 0 }
 0x49a   : > { %v742_v3 = vpop.permute.xlu1 %741 }
 0x4a0   : > { %v1924_v62 = vpop.eup %1923 }
 0x4a1   : > { %v690_v0 = vmul.f32 %v1924_v62, %v1922_v59 }
 0x4a3   : > { %v691_v2 = vpack.c.bf16 %v690_v0, %v690_v0  ;;  %v1643_v0 = vld [vmem:[%s2480_s5 + $0x8] sm:$0xf] }
 0x4a5   : > { %1728 = vmatmul.mubr.msk.bf16.vlgmr.msra.gmra.mxu1 %vm679_vm5, %v691_v2 }
 0x4a6   : > { %1732 = vmatpush3.bf16.xpose.msra.mxu1 %v749_v1  ;;  %1733 = vmatprep.mubr.msk.bf16.mxu1 %vm2038_vm3, %v2037_v44  ;;  %v1060_v1 = vsel %vm855_vm6, %v1643_v0, 0  ;;  %v1914_v0 = vld [vmem:[%s2486_s11 + $0x30] sm:$0xff]  }
 0x4a7   : > { %1743 = vmatprep.subr.bf16.mxu1 %v2037_v44 }
 0x4ad   : > { %1734 = vmatmul.mubr.msk.bf16.vlgmr.msra.gmra.mxu1 %vm632_vm4, %v742_v3 }
 0x4ae   : > { %1745 = vmatprep.mubr.msk.bf16.mxu1 %vm2038_vm3, %v2037_v44  ;;  %1744 = vmatpush3.bf16.msra.mxu1 %v857_v19  ;;  %v1647_v19 = vld [vmem:[%s2480_s5 + $0xc] sm:$0xf] }
 0x4af   : > { %1755 = vmatprep.subr.bf16.mxu1 %v2037_v44 }
 0x565   : > { %v732_v4 = vpop.f32.mrf.mxu1 }
 0x566   : > { %v738_v27 = vpack.c.bf16 %v732_v4, %v732_v4 }
 0x567   : > { %v1729_v5 = vpop.f32.mrf.mxu1 }
 0x569   : > { %v735_v6 = vpop.f32.mrf.mxu1 }
 0x56b   : > { %v1730_v7 = vpop.f32.mrf.mxu1 }
 0x56d   : > { %v785_v8 = vpop.f32.mrf.mxu1 }
 0x56e   : > { %v791_v9 = vsel %vm679_vm5, %v785_v8, -inf }
 0x56f   : > { %792 = vmax.xlane.f32.xlu1 %v791_v9  ;;  %v1735_v10 = vpop.f32.mrf.mxu1 }
 0x571   : > { %v788_v11 = vpop.f32.mrf.mxu1 }
 0x573   : > { %v1736_v12 = vpop.f32.mrf.mxu1 }
 0x5f8   : > { %v793_v13 = vpop.xlane.xlu1 %792 }
 0x5f9   : > { %v794_v14 = vsub.f32 %v785_v8, %v793_v13 }
 0x5fb   : > { %v795_v15 = vmul.f32 1.442695, %v794_v14 }
 0x5fd   : > { %1925 = vpow2.f32 %v795_v15 }
 0x60a   : > { %v1926_v16 = vpop.eup %1925 }
 0x60b   : > { %v797_v17 = vsel %vm679_vm5, %v1926_v16, 0.0 }
 0x60c   : > { %798 = vadd.xlane.f32.xlu0 %v797_v17 }
 0x622   : > { %803 = vrot.lane.b32.xlu0 %v2240_v43, %s2043_s27  ;;  %s2049_s27 = smov 40  }
 0x626   : > { %947 = vrot.lane.b32.xlu0 %v2240_v43, %s2044_s29  ;;  %s2048_s29 = smov 104  }
 0x62a   : > { %945 = vrot.lane.b32.xlu0 %v2254_v49, %s2045_s19 }
 0x695   : > { %v799_v20 = vpop.xlane.xlu0 %798 }
 0x696   : > { %1927 = vrcp.f32 %v799_v20 }
 0x699   : > { %v804_v21 = vpop.permute.xlu0 %803 }
 0x69a   : > { %1738 = vmatpush3.bf16.msra.mxu0 %v804_v21  ;;  %v1218_v21 = vsel %vm855_vm6, %v1647_v19, 0 }
 0x69b   : > { %1749 = vmatprep.subr.bf16.mxu0 %v2037_v44 }
 0x69d   : > { %v948_v28 = vpop.permute.xlu0 %947 }
 0x69e   : > { %v953_v31 = vsel %vm632_vm4, %v948_v28, 0 }
 0x6a1   : > { %v946_v36 = vpop.permute.xlu0 %945 }
 0x6a3   : > { %v1928_v22 = vpop.eup %1927 }
 0x6a4   : > { %v801_v24 = vmul.f32 %v1928_v22, %v1926_v16 }
 0x6a6   : > { %v802_v25 = vpack.c.bf16 %v801_v24, %v801_v24 }
 0x6a8   : > { %1740 = vmatmul.mubr.msk.bf16.vlgmr.msra.gmra.mxu0 %vm679_vm5, %v802_v25 }
 0x6a9   : > { %1750 = vmatpush3.bf16.msra.mxu0 %v903_v26  ;;  %1751 = vmatprep.mubr.msk.bf16.mxu0 %vm2038_vm3, %v2037_v44 }
 0x6aa   : > { %1761 = vmatprep.subr.bf16.mxu0 %v2037_v44 }
 0x6b0   : > { %1752 = vmatmul.mubr.msk.bf16.vlgmr.msra.gmra.mxu0 %vm632_vm4, %v738_v27 }
 0x6b1   : > { %1763 = vmatprep.mubr.msk.bf16.mxu0 %vm2038_vm3, %v2037_v44 }
 0x768   : > { %v843_v29 = vpop.f32.mrf.mxu0 }
 0x769   : > { %v849_v30 = vpack.c.bf16 %v843_v29, %v843_v29 }
 0x76a   : > { %v1741_v32 = vpop.f32.mrf.mxu0 }
 0x76b   : > { %1746 = vmatmul.mubr.msk.bf16.vlgmr.msra.gmra.mxu1 %vm632_vm4, %v849_v30 }
 0x76c   : > { %1756 = vmatpush3.bf16.xpose.msra.mxu1 %v953_v31  ;;  %v846_v33 = vpop.f32.mrf.mxu0  ;;  %1757 = vmatprep.mubr.msk.bf16.mxu1 %vm2038_vm3, %v2037_v44 }
 0x76d   : > { %1767 = vmatprep.subr.bf16.mxu1 %v2037_v44 }
 0x76e   : > { %v1742_v34 = vpop.f32.mrf.mxu0 }
 0x770   : > { %v2301_v35 = vpop.f32.mrf.mxu0 }
 0x772   : > { %v1753_v37 = vpop.f32.mrf.mxu0 }
 0x773   : > { %1758 = vmatmul.mubr.msk.bf16.vlgmr.msra.gmra.mxu1 %vm632_vm4, %v946_v36  ;;  %v1649_v37 = vld [vmem:[%s2481_s6] ss:$0 sm:$0xff] }
 0x774   : > { %v942_v38 = vpop.f32.mrf.mxu0  ;;  %1769 = vmatprep.mubr.msk.bf16.mxu1 %vm2038_vm3, %v2037_v44  ;;  %1768 = vmatpush3.bf16.msra.mxu1 %v1060_v1  ;;  %v1915_v1 = vld [vmem:[%s2486_s11 + $0x28] sm:$0xff]  }
 0x775   : > { %1779 = vmatprep.subr.bf16.mxu1 %v2037_v44 }
 0x776   : > { %v1754_v39 = vpop.f32.mrf.mxu0 }
 0x82b   : > { %v2306_v40 = vpop.f32.mrf.mxu1 }
 0x82c   : > { %v940_v17 = vadd.f32 %v2301_v35, %v2306_v40 }
 0x82d   : > { %v1747_v41 = vpop.f32.mrf.mxu1 }
 0x82f   : > { %v896_v42 = vpop.f32.mrf.mxu1 }
 0x831   : > { %v1748_v45 = vpop.f32.mrf.mxu1 }
 0x833   : > { %v989_v46 = vpop.f32.mrf.mxu1 }
 0x834   : > { %v995_v47 = vsel %vm679_vm5, %v989_v46, -inf }
 0x835   : > { %996 = vmax.xlane.f32.xlu1 %v995_v47  ;;  %v1759_v48 = vpop.f32.mrf.mxu1 }
 0x837   : > { %v992_v50 = vpop.f32.mrf.mxu1 }
 0x839   : > { %v1760_v51 = vpop.f32.mrf.mxu1 }
 0x846   : > { %1007 = vrot.lane.b32.xlu1 %v2240_v43, %s2046_s21 }
 0x84a   : > { %1105 = vrot.lane.b32.xlu1 %v2240_v43, %s2047_s28 }
 0x84e   : > { %1103 = vrot.lane.b32.xlu1 %v2254_v49, %s2048_s29  ;;  %s620_s29 = scalar_lea.vmem %s2207_s25, %s1633_s13 }
 0x84f   : > { %v621_v34 = vld [vmem:[%s620_s29] sm:$0xff] }
 0x8be   : > { %v997_v52 = vpop.xlane.xlu1 %996 }
 0x8bf   : > { %v998_v53 = vsub.f32 %v989_v46, %v997_v52  ;;  %v1911_v52 = vld [vmem:[%s2484_s9 + $0x8] sm:$0xff]  }
 0x8c1   : > { %v999_v54 = vmul.f32 1.442695, %v998_v53  ;;  %v1912_v53 = vld [vmem:[%s2484_s9] sm:$0xff]  }
 0x8c2   : > { %v1008_v57 = vpop.permute.xlu1 %1007 }
 0x8c3   : > { %1929 = vpow2.f32 %v999_v54  ;;  %1762 = vmatpush3.bf16.msra.mxu0 %v1008_v57 }
 0x8c4   : > { %1773 = vmatprep.subr.bf16.mxu0 %v2037_v44 }
 0x8c6   : > { %v1106_v60 = vpop.permute.xlu1 %1105 }
 0x8c7   : > { %v1111_v62 = vsel %vm632_vm4, %v1106_v60, 0  ;;  %v1651_v60 = vld [vmem:[%s2483_s8] ss:$0 sm:$0xff] }
 0x8ca   : > { %v1104_v63 = vpop.permute.xlu1 %1103 }
 0x8d0   : > { %v1930_v55 = vpop.eup %1929 }
 0x8d1   : > { %v1001_v56 = vsel %vm679_vm5, %v1930_v55, 0.0 }
 0x8d2   : > { %1002 = vadd.xlane.f32.xlu0 %v1001_v56 }
 0x95b   : > { %v1003_v58 = vpop.xlane.xlu0 %1002 }
 0x95c   : > { %1931 = vrcp.f32 %v1003_v58  ;;  %v1650_v58 = vld [vmem:[%s2482_s7] ss:$0 sm:$0xff] }
 0x969   : > { %v1932_v59 = vpop.eup %1931 }
 0x96a   : > { %v1005_v61 = vmul.f32 %v1932_v59, %v1930_v55 }
 0x96c   : > { %v1006_v49 = vpack.c.bf16 %v1005_v61, %v1005_v61 }
 0x96e   : > { %1764 = vmatmul.mubr.msk.bf16.vlgmr.msra.gmra.mxu0 %vm679_vm5, %v1006_v49 }
 0x96f   : > { %1774 = vmatpush3.bf16.xpose.msra.mxu0 %v1111_v62  ;;  %1775 = vmatprep.mubr.msk.bf16.mxu0 %vm2038_vm3, %v2037_v44 }
 0x970   : > { %1785 = vmatprep.subr.bf16.mxu0 %v2037_v44 }
 0x976   : > { %1776 = vmatmul.mubr.msk.bf16.vlgmr.msra.gmra.mxu0 %vm632_vm4, %v1104_v63  ;;  %v1913_v63 = vld [vmem:[%s2486_s11 + $0x38] sm:$0xff]  }
 0x977   : > { %1787 = vmatprep.mubr.msk.bf16.mxu0 %vm2038_vm3, %v2037_v44  ;;  %1786 = vmatpush3.bf16.msra.mxu0 %v1218_v21 }
 0x978   : > { %1799 = vmatprep.subr.bf16.mxu0 %v2037_v44 }
 0xa2e   : > { %v1047_v2 = vpop.f32.mrf.mxu0 }
 0xa2f   : > { %v1053_v3 = vpack.c.bf16 %v1047_v2, %v1047_v2  ;;  %v1916_v2 = vld [vmem:[%s2486_s11 + $0x20] sm:$0xff]  }
 0xa30   : > { %v1765_v4 = vpop.f32.mrf.mxu0 }
 0xa31   : > { %1770 = vmatmul.mubr.msk.bf16.vlgmr.msra.gmra.mxu1 %vm632_vm4, %v1053_v3  ;;  %v1917_v3 = vld [vmem:[%s2486_s11 + $0x18] sm:$0xff]   ;;  %v1918_v4 = vld [vmem:[%s2486_s11 + $0x10] sm:$0xff]  }
 0xa32   : > { %v1050_v5 = vpop.f32.mrf.mxu0  ;;  %1781 = vmatprep.mubr.msk.bf16.mxu1 %vm2038_vm3, %v2037_v44 }
 0xa33   : > { %v1919_v5 = vld [vmem:[%s2486_s11 + $0x8] sm:$0xff]  }
 0xa34   : > { %v1766_v6 = vpop.f32.mrf.mxu0 }
 0xa35   : > { %v1920_v6 = vld [vmem:[%s2486_s11] sm:$0xff]  }
 0xa36   : > { %v1147_v7 = vpop.f32.mrf.mxu0 }
 0xa37   : > { %v1153_v8 = vsel %vm679_vm5, %v1147_v7, -inf }
 0xa38   : > { %1154 = vmax.xlane.f32.xlu1 %v1153_v8  ;;  %v1777_v9 = vpop.f32.mrf.mxu0 }
 0xa3a   : > { %v1150_v10 = vpop.f32.mrf.mxu0 }
 0xa3c   : > { %v1778_v11 = vpop.f32.mrf.mxu0 }
 0xac1   : > { %v1155_v12 = vpop.xlane.xlu1 %1154 }
 0xac2   : > { %v1156_v13 = vsub.f32 %v1147_v7, %v1155_v12  ;;  %v1652_v7 = vld [vmem:[%s2485_s10] ss:$0 sm:$0xff] }
 0xac4   : > { %v1157_v14 = vmul.f32 1.442695, %v1156_v13 }
 0xac6   : > { %1933 = vpow2.f32 %v1157_v14 }
 0xad3   : > { %v1934_v15 = vpop.eup %1933 }
 0xad4   : > { %v1159_v16 = vsel %vm679_vm5, %v1934_v15, 0.0 }
 0xad5   : > { %1160 = vadd.xlane.f32.xlu0 %v1159_v16 }
 0xaeb   : > { %1165 = vrot.lane.b32.xlu0 %v2240_v43, %s2049_s27  ;;  %s1666_s27 = sshll.u32 %s2021_s17, 1 }
 0xaec   : > { %s1508_s21 = sadd.s32 %s2017_s16, %s1666_s27  ;;  %s2511_s16 = sand.u32 1, %s2009_s30  }
 0xaed   : > { %s1667_s19 = sshll.u32 %s1508_s21, 7  ;;  %s1492_s17 = scalar_lea.sflag [#allocation4], %s2511_s16 }
 0xaee   : > { %s2418_s0 = scalar_lea.hbm %s2510_s22, %s1667_s19  ;;  %s1941_s27 = scalar_lea.vmem %s2420_s24, 128 }
 0xaef   : > { %p1942_p0 = scmp.ne.s32.totalorder %s2420_s24, %s1941_s27  ;;  %s2050_s21 = smov [#allocation3]  }
 0xaf0   : > { %s1945_s28 = sshll.u32 %s2050_s21, 4  ;;  %s1946_s28 = int_to_ptr.vmem [resolvable:$false] %s1945_s28 }
 0xaf1   : > { %v1096_v18 = vpop.f32.mrf.mxu1  ;;  %p1943_p1 = pnand %p1942_p0, %p2177_p3  ;;  %s1947_s29 = scalar_lea.vmem %s1946_s28, 256 }
 0xaf2   : > { %v1102_v20 = vadd.f32 %v1096_v18, %v940_v17  ;;  %p1948_p4 = scmp.lt.s32.totalorder %s2420_s24, %s1946_s28  ;;  %p1949_p5 = scmp.lt.s32.totalorder %s1947_s29, %s1941_s27 }
 0xaf3   : > { %v1771_v22 = vpop.f32.mrf.mxu1  ;;  %p1944_p2 = pneg %p1943_p1 }
 0xaf4   : > { %v1656_v22 = vld [vmem:[%s2487_s12] ss:$0 sm:$0xff]  ;;  %p1950_p6 = por %p1949_p5, %p1948_p4 }
 0xaf5   : > { %v1099_v23 = vpop.f32.mrf.mxu1 }
 0xaf6   : > { %p1951_p7 = pnand %p1950_p6, %p1944_p2 }
 0xaf7   : > { %v1772_v24 = vpop.f32.mrf.mxu1 }
 0xb5e   : > { %v1161_v25 = vpop.xlane.xlu0 %1160 }
 0xb5f   : > { %1935 = vrcp.f32 %v1161_v25 }
 0xb62   : > { %v1166_v43 = vpop.permute.xlu0 %1165 }
 0xb63   : > { %1780 = vmatpush3.bf16.msra.mxu1 %v1166_v43 }
 0xb64   : > { %1791 = vmatprep.subr.bf16.mxu1 %v2037_v44 }
 0xb6c   : > { %v1936_v26 = vpop.eup %1935 }
 0xb6d   : > { %v1163_v27 = vmul.f32 %v1936_v26, %v1934_v15 }
 0xb6f   : > { %v1164_v28 = vpack.c.bf16 %v1163_v27, %v1163_v27 }
 0xb71   : > { %1782 = vmatmul.mubr.msk.bf16.vlgmr.msra.gmra.mxu1 %vm679_vm5, %v1164_v28 }
 0xb72   : > { %1795 = vmatprep.mubr.msk.bf16.mxu1 %vm2038_vm3, %v2037_v44  ;;  %1792 = vmatpush3.bf16.msra.mxu1 %v1911_v52 }
 0xb73   : > { %1793 = vmatprep.subr.bf16.mxu1 %v2037_v44 }
 0xb76   : > { %1794 = vmatpush3.bf16.msra.mxu1 %v1912_v53 }
 0xc31   : > { %v1205_v29 = vpop.f32.mrf.mxu1 }
 0xc32   : > { %v1211_v30 = vpack.c.bf16 %v1205_v29, %v1205_v29 }
 0xc33   : > { %v1783_v31 = vpop.f32.mrf.mxu1 }
 0xc34   : > { %1788 = vmatmul.mubr.msk.bf16.vlgmr.msra.gmra.mxu0 %vm632_vm4, %v1211_v30 }
 0xc35   : > { %v1208_v32 = vpop.f32.mrf.mxu1  ;;  %1815 = vmatprep.mubr.msk.bf16.mxu0 %vm2038_vm3, %v2037_v44  ;;  %1800 = vmatpush3.bf16.msra.mxu0 %v1913_v63 }
 0xc36   : > { %1801 = vmatprep.subr.bf16.mxu0 %v2037_v44 }
 0xc37   : > { %v1784_v33 = vpop.f32.mrf.mxu1 }
 0xc39   : > { %1802 = vmatpush3.bf16.msra.mxu0 %v1914_v0 }
 0xc3a   : > { %1803 = vmatprep.subr.bf16.mxu0 %v2037_v44 }
 0xc3d   : > { %1804 = vmatpush3.bf16.msra.mxu0 %v1915_v1 }
 0xc3e   : > { %1805 = vmatprep.subr.bf16.mxu0 %v2037_v44 }
 0xc41   : > { %1806 = vmatpush3.bf16.msra.mxu0 %v1916_v2 }
 0xc42   : > { %1807 = vmatprep.subr.bf16.mxu0 %v2037_v44 }
 0xc45   : > { %1808 = vmatpush3.bf16.msra.mxu0 %v1917_v3 }
 0xc46   : > { %1809 = vmatprep.subr.bf16.mxu0 %v2037_v44 }
 0xc49   : > { %1810 = vmatpush3.bf16.msra.mxu0 %v1918_v4 }
 0xc4a   : > { %1811 = vmatprep.subr.bf16.mxu0 %v2037_v44 }
 0xc4d   : > { %1812 = vmatpush3.bf16.msra.mxu0 %v1919_v5 }
 0xc4e   : > { %1813 = vmatprep.subr.bf16.mxu0 %v2037_v44 }
 0xc51   : > { %1814 = vmatpush3.bf16.msra.mxu0 %v1920_v6 }
 0xcf4   : > { %v1254_v35 = vpop.f32.mrf.mxu0 }
 0xcf5   : > { %v1260_v36 = vadd.f32 %v1254_v35, %v1102_v20 }
 0xcf6   : > { %v1789_v38 = vpop.f32.mrf.mxu0 }
 0xcf7   : > { %v1261_v39 = vadd.f32 %v1260_v36, %v621_v34 }
 0xcf8   : > { %v1257_v40 = vpop.f32.mrf.mxu0 }
 0xcf9   : > { %v2353_v41 = vadd.f32 %v1649_v37, %v1261_v39 }
 0xcfa   : > { %v1790_v42 = vpop.f32.mrf.mxu0 }
 0xcfb   : > { %v1273_v45 = vsel %vm1272_vm7, %v2353_v41, 0.0 }
 0xcfc   : > { %1274 = vadd.xlane.f32.xlu0 %v1273_v45 }
 0xd85   : > { %v1275_v46 = vpop.xlane.xlu0 %1274 }
 0xd86   : > { %v1277_v47 = vmul.f32 0.03125, %v1275_v46 }
 0xd88   : > { %v1278_v48 = vsub.f32 %v2353_v41, %v1277_v47 }
 0xd8a   : > { %v1279_v50 = vmul.f32 %v1278_v48, %v1278_v48 }
 0xd8c   : > { %v1280_v51 = vsel %vm1272_vm7, %v1279_v50, 0.0 }
 0xd8d   : > { %1281 = vadd.xlane.f32.xlu1 %v1280_v51 }
 0xe16   : > { %v1282_v54 = vpop.xlane.xlu1 %1281 }
 0xe17   : > { %v1283_v55 = vmul.f32 0.03125, %v1282_v54 }
 0xe19   : > { %v1284_v56 = vadd.f32 1e-06, %v1283_v55 }
 0xe1b   : > { %1937 = vrsqrt.f32 %v1284_v56 }
 0xe28   : > { %v1938_v57 = vpop.eup %1937 }
 0xe29   : > { %v1286_v59 = vmul.f32 %v1938_v57, %v1278_v48 }
 0xe2b   : > { %v1293_v61 = vmul.f32 %v1650_v58, %v1286_v59 }
 0xe2d   : > { %v1300_v62 = vadd.f32 %v1651_v60, %v1293_v61 }
 0xe2f   : > { %v1301_v49 = vpack.c.bf16 %v1300_v62, %v1300_v62 }
 0xe31   : > { %1796 = vmatmul.mubr.msk.bf16.vlgmr.msra.gmra.mxu1 %vm1272_vm7, %v1301_v49 }
 0xef1   : > { %v1362_v8 = vpop.f32.mrf.mxu1 }
 0xef2   : > { %v1363_v9 = vadd.f32 %v1652_v7, %v1362_v8 }
 0xef3   : > { %v1797_v10 = vpop.f32.mrf.mxu1 }
 0xef4   : > { %v1368_v11 = vmul.f32 %v1363_v9, %v1363_v9 }
 0xef5   : > { %v1365_v12 = vpop.f32.mrf.mxu1 }
 0xef6   : > { %v1369_v13 = vmul.f32 %v1368_v11, %v1363_v9 }
 0xef7   : > { %v1798_v14 = vpop.f32.mrf.mxu1 }
 0xef8   : > { %v1370_v15 = vmul.f32 0.044715, %v1369_v13 }
 0xefa   : > { %v1371_v16 = vadd.f32 %v1370_v15, %v1363_v9 }
 0xefc   : > { %v1372_v17 = vmul.f32 0.7978846, %v1371_v16 }
 0xefe   : > { %1939 = vtanh.f32 %v1372_v17 }
 0xf0b   : > { %v1940_v44 = vpop.eup %1939 }
 0xf0c   : > { %v1374_v18 = vadd.f32 1.0, %v1940_v44 }
 0xf0e   : > { %v1375_v19 = vmul.f32 0.5, %v1374_v18 }
 0xf10   : > { %v1376_v20 = vmul.f32 %v1375_v19, %v1363_v9 }
 0xf12   : > { %v1377_v21 = vpack.c.bf16 %v1376_v20, %v1376_v20 }
 0xf14   : > { %1816 = vmatmul.mubr.bf16.vlgmr.msra.gmra.mxu0 %v1377_v21 }
 0xfd4   : > { %v1483_v23 = vpop.f32.mrf.mxu0 }
 0xfd5   : > { %v1484_v24 = vadd.f32 %v1656_v22, %v1483_v23 }
 0xfd6   : > { %v1817_v25 = vpop.f32.mrf.mxu0 }
 0xfd7   : > { %v1489_v43 = vadd.f32 %v1484_v24, %v2353_v41 }
 0xfd8   : > { %v1486_v26 = vpop.f32.mrf.mxu0 }
 0xfd9   : > { %1490 = vst.msk [vmem:[%s475_s23] sm:$0xff] %vm1272_vm7, %v1489_v43 }
 0xfda   : > { %v1818_v27 = vpop.f32.mrf.mxu0 }
 0xfdb   : > { %1954 = shalt.err (!%p1951_p7)
}
 0xfdc   : > { %s1955_s18 = scalar_lea.hbm %s2418_s0, 128  ;;  %s1959_s25 = scalar_lea.hbm %s2510_s22, 512 }
 0xfdd   : > { %p1956_p9 = scmp.ne.s32.totalorder %s2418_s0, %s1955_s18  ;;  %p1960_p12 = scmp.lt.s32.totalorder %s2418_s0, %s2510_s22 }
 0xfde   : > { %p1961_p13 = scmp.lt.s32.totalorder %s1959_s25, %s1955_s18 }
 0xfdf   : > { %p1957_p10 = pnand %p1956_p9, %p2177_p3 }
 0xfe0   : > { %p1962_p0 = por %p1961_p13, %p1960_p12 }
 0xfe1   : > { %p1958_p11 = pneg %p1957_p10 }
 0xfe3   : > { %p1963_p1 = pnand %p1962_p0, %p1958_p11 }
 0xfe5   : > { %1966 = shalt.err (!%p1963_p1)
}
 0xfe6   : > { %1819 = dma.vmem_to_hbm [thread:$0]  (%p2177_p3), %s2420_s24, 128, %s2418_s0, %s1492_s17  }
 0xfe7 PF: > { %s2512_s27 = sld [smem:[#allocation6_spill]]  ;;  %p1825_p2 = scmp.ge.s32.totalorder %s2033_s20, 2 }
 0xfe9   : > { %p1822_p4 = pnand %p1825_p2, %p2186_p8 }
 0xfeb   : > { %p1823_p5 = pneg %p1822_p4 }
 0xfed   : > { %s1527_s28 = sand.u32 1, %s2512_s27  }
 0xfee   : > { %s1528_s29 = scalar_lea.sflag [#allocation4], %s1527_s28 }
 0xfef   : > { %2000 = dma.done.wait (%p1823_p5), %s1528_s29, 128  }
 0xff0   : > { %2002 = vsyncadd (%p1823_p5), %s1528_s29, 4294967168  ;;  %s28_s20 = sadd.s32 1, %s2033_s20   ;;  %s2514_s26 = sld [smem:[#allocation12_spill]] }
 0xff1   : > { %p25_p6 = scmp.ge.s32.totalorder %s28_s20, 6   ;;  %s2515_s16 = sld [smem:[#allocation7_spill]] }
 0xff2   : > { %s2516_s17 = sld [smem:[#allocation8_spill]]  ;;  %s2519_s29 = smov %s2009_s30 }
 0xff3   : > { %s2517_s18 = sld [smem:[#allocation9_spill]]  ;;  %s2520_s30 = smov %s2013_s15 }
 0xff4   : > { %s2518_s19 = sld [smem:[#allocation10_spill]]  ;;  %27 = sbr.rel (!%p25_p6) target bundleno = 8 (0x8), region = 128 }
 0xff6   : > { %s2521_s15 = smov %s2514_s26 }
 0xff9   :  { %1541 = vsyncpa [#allocation4], 1 }
 0xffa   :  { %1543 = vsyncpa [#allocation4 + $0x1], 1 }

</bundles_post_ra>
